<compile_context>
chip_gen: v5e
topology: v5e:2x2
jax: 0.10.0
libtpu: 0.0.40
codegen_flags: <defaults>
</compile_context>

<pallas_src>
import functools

import jax
import jax.numpy as jnp
from jax import lax
from jax.experimental import pallas as pl
from jax.experimental.pallas import tpu as pltpu

_EPS = 1e-5  # BatchNorm1d default eps


def _elu(v):
    # ELU(alpha=1).  exp arg clamped so the dead branch can't produce inf.
    return jnp.where(v > 0, v, jnp.exp(jnp.minimum(v, 0.0)) - 1.0)


def _mxu_dot(a, b):
    # Cast operands to bf16 (f32 accumulation) once the contraction dim is MXU
    # sized; at the demo channel widths this stays pure f32 (exact numerics).
    # TODO(synk): for production channel counts, also pad C_in/C_out to a
    # multiple of 128 (lane-dense layout -> unmasked vst on the output slab).
    if a.shape[-1] >= 128 and a.dtype == jnp.float32 and b.dtype == jnp.float32:
        a = a.astype(jnp.bfloat16)
        b = b.astype(jnp.bfloat16)
    return jnp.dot(a, b, preferred_element_type=jnp.float32)


def down_kernel(x_ref, w_in_ref, b_in_ref, ws_ref, gs_ref, betas_ref,
                w_res_ref, b_res_ref, out_ref, h_scratch,
                *, k, factor, dilations, seq_len):
    nl, _ = x_ref.shape
    nlout, c_out = out_ref.shape
    inv_nl = 1.0 / float(nl)

    x = x_ref[...]                                   # (NL, Cin)

    # In-sequence position of every row (batch boundary every seq_len rows);
    # one float mask per unique causal shift, hoisted out of the stack loop so
    # the compare/broadcast is not re-emitted per tap.
    row = lax.broadcasted_iota(jnp.int32, (nl, 1), 0)
    pos = row % seq_len
    uniq_shifts = sorted({d * (k - 1 - j) for d in dilations for j in range(k)}
                         - {0})
    masks = {s: (pos >= s).astype(jnp.float32)
             for s in uniq_shifts if s < seq_len}

    # ---- InConv: 1x1 conv == channel matmul --------------------------------
    h = _mxu_dot(x, w_in_ref[...]) + b_in_ref[...]

    # ---- Causal dilated conv stacks: ELU -> conv -> BatchNorm (train mode) --
    # Conv bias is omitted: a per-channel constant offset is cancelled exactly
    # by the training-mode BatchNorm mean subtraction and leaves var unchanged.
    for i, d in enumerate(dilations):
        h = _elu(h)

        taps, valid_js = [], []
        for j in range(k):
            s = d * (k - 1 - j)              # static causal shift of tap j
            if s >= seq_len:
                continue                     # tap only sees causal padding
            if s == 0:
                taps.append(h)
            else:
                # sublane rotate + mask: row r reads h[r-s]; rows whose
                # in-sequence position < s are causal padding (and would leak
                # across batch boundaries), so zero them.
                taps.append(pltpu.roll(h, shift=s, axis=0) * masks[s])
            valid_js.append(j)

        # Single wide-K MXU call per stack: (NL, k*C) @ (k*C, C).
        h_wide = taps[0] if len(taps) == 1 else jnp.concatenate(taps, axis=1)
        if len(valid_js) == k:
            w_fused = ws_ref[i]                          # (k*C, C), pre-fused
        else:
            w_fused = jnp.concatenate(
                [ws_ref[i, j * c_out:(j + 1) * c_out, :] for j in valid_js],
                axis=0)
        acc = _mxu_dot(h_wide, w_fused)

        # BatchNorm1d over N*L: two-pass (centered) variance for robustness,
        # folded into a single per-channel scale + shift.
        mean = jnp.sum(acc, axis=0, keepdims=True) * inv_nl
        diff = acc - mean
        var = jnp.sum(diff * diff, axis=0, keepdims=True) * inv_nl
        scale = lax.rsqrt(var + _EPS) * gs_ref[i]
        h = diff * scale + betas_ref[i]

    # ---- AvgPool1d(factor, factor) ------------------------------------------
    # Pre-sum the pooling window with XLU rolls, then ONE strided sublane read
    # (instead of `factor` strided loads on the vld slots).
    acc_pool = h
    for f in range(1, factor):
        acc_pool = acc_pool + pltpu.roll(h, shift=nl - f, axis=0)
    h_scratch[...] = acc_pool
    pooled = h_scratch[pl.ds(0, nlout, stride=factor), :] * (1.0 / float(factor))

    # ---- Residual Conv1d(Cin->Cout, kernel=factor, stride=factor) -----------
    # Single wide-K MXU call: (NLout, factor*Cin) @ (factor*Cin, C).
    xs = [x_ref[pl.ds(f, nlout, stride=factor), :] for f in range(factor)]
    x_wide = xs[0] if factor == 1 else jnp.concatenate(xs, axis=1)
    res = _mxu_dot(x_wide, w_res_ref[...]) + b_res_ref[...]

    out_ref[...] = (pooled + res).astype(out_ref.dtype)


# ---------------------------------------------------------------------------
# Wrapper / glue
# ---------------------------------------------------------------------------
def _pad_lanes(c):
    return ((c + 127) // 128) * 128


def _pad_sublanes(r):
    return ((r + 7) // 8) * 8


def _vmem_capacity_bytes():
    try:
        info = pltpu.get_tpu_info()
        cap = getattr(info, "vmem_capacity_bytes", None)
        if cap:
            return int(cap)
    except Exception:
        pass
    return 64 * 2 ** 20  # conservative: v7x per-TensorCore VMEM


def init_params(key, c_in, c_out, k, factor, n_stacks=4):
    ks = jax.random.split(key, 8)

    def unif(kk, shape, fan_in):
        bound = 1.0 / jnp.sqrt(float(fan_in))
        return jax.random.uniform(kk, shape, jnp.float32, -bound, bound)

    return {
        # InConv (1x1): weight stored as (C_in, C_out)
        "w_in": unif(ks[0], (c_in, c_out), c_in),
        "b_in": unif(ks[1], (1, c_out), c_in),
        # causal-conv stacks: weight stored as (stack, tap, C_out, C_out)
        "ws": unif(ks[2], (n_stacks, k, c_out, c_out), c_out * k),
        "bs": unif(ks[3], (n_stacks, 1, c_out), c_out * k),  # cancelled by BN
        # BatchNorm affine params (PyTorch default init)
        "gs": jnp.ones((n_stacks, 1, c_out), jnp.float32),
        "betas": jnp.zeros((n_stacks, 1, c_out), jnp.float32),
        # Residual conv: weight stored as (tap, C_in, C_out)
        "w_res": unif(ks[4], (factor, c_in, c_out), c_in * factor),
        "b_res": unif(ks[5], (1, c_out), c_in * factor),
    }


def down_forward(x_ncl, params, *, k, factor, dilations=(1, 2, 4, 8)):
    n, c_in, length = x_ncl.shape
    c_out = params["w_in"].shape[1]
    n_stacks = len(dilations)
    if length % factor:
        # TODO(synk): handle the trailing remainder (PyTorch truncates); the
        # flattened-slab strided pooling / residual reads assume L % factor == 0.
        raise NotImplementedError("seq_len must be divisible by factor")
    lout = length // factor
    nl, nlout = n * length, n * lout

    # NCL -> (N*L, C_in) channels-last slab
    x2d = jnp.transpose(x_ncl, (0, 2, 1)).reshape(nl, c_in)

    # Pre-fuse per-tap weights into wide-K matmul layouts (no in-kernel reshape).
    ws_fused = params["ws"].reshape(n_stacks, k * c_out, c_out)
    w_res_fused = params["w_res"].reshape(factor * c_in, c_out)

    vmem = pl.BlockSpec(memory_space=pltpu.MemorySpace.VMEM)

    # ---- lane/sublane-padded VMEM budget (f32, last dim padded to 128 lanes) --
    rows, rows_out = _pad_sublanes(nl), _pad_sublanes(nlout)
    n_shift = len({d * (k - 1 - j) for d in dilations for j in range(k)} - {0})
    slab_bytes = 4 * rows * _pad_lanes(c_out)      # one (NL, C_out) f32 slab
    param_bytes = 4 * (
        _pad_sublanes(c_in) * _pad_lanes(c_out)
        + n_stacks * _pad_sublanes(k * c_out) * _pad_lanes(c_out)
        + _pad_sublanes(factor * c_in) * _pad_lanes(c_out)
        + (2 * n_stacks + 2) * 8 * _pad_lanes(c_out))
    need_bytes = (
        4 * rows * _pad_lanes(c_in)                # x2d
        + 4 * slab_bytes                           # h, centered diff, temp, scratch
        + 4 * rows * _pad_lanes(k * c_out)         # wide tap concat
        + 4 * rows * 128 * (1 + n_shift)           # iota/pos + per-shift masks
        + 4 * rows_out * (_pad_lanes(factor * c_in) + 2 * _pad_lanes(c_out))
        + param_bytes)

    capacity = _vmem_capacity_bytes()
    usable = int(0.88 * capacity)                  # headroom for compiler scratch
    if need_bytes > usable:
        # TODO(synk): row-tiled grid with two-pass BatchNorm per stack (pass 1:
        # conv + per-channel sum/sum-sq partials over an "arbitrary" axis;
        # pass 2: normalize), halo rows for the dilated taps, and a "parallel"
        # row axis for v7x megacore, once the slab exceeds VMEM.
        raise NotImplementedError(
            f"VMEM-resident slab needs ~{need_bytes >> 20} MiB, only "
            f"{usable >> 20} MiB usable on this TPU generation")
    vmem_limit = int(min(max(need_bytes * 3 // 2, 32 * 2 ** 20), usable))

    param_elems = (c_in * c_out + c_out + n_stacks * k * c_out * c_out
                   + 2 * n_stacks * c_out + factor * c_in * c_out + c_out)
    flops = (2 * nl * c_in * c_out                       # InConv
             + 2 * n_stacks * k * nl * c_out * c_out     # dilated conv taps
             + 2 * factor * nlout * c_in * c_out         # residual conv
             + 12 * n_stacks * nl * c_out)               # ELU / BN elementwise
    cost = pl.CostEstimate(
        flops=int(flops),
        transcendentals=int(n_stacks * nl * c_out),
        bytes_accessed=int(4 * (nl * c_in + nlout * c_out + param_elems)))

    out2d = pl.pallas_call(
        functools.partial(down_kernel, k=k, factor=factor,
                          dilations=tuple(dilations), seq_len=length),
        out_shape=jax.ShapeDtypeStruct((nlout, c_out), jnp.float32),
        in_specs=[vmem] * 8,
        out_specs=vmem,
        scratch_shapes=[pltpu.VMEM((nl, c_out), jnp.float32)],
        compiler_params=pltpu.CompilerParams(vmem_limit_bytes=vmem_limit),
        cost_estimate=cost,
    )(x2d, params["w_in"], params["b_in"], ws_fused,
      params["gs"], params["betas"], w_res_fused, params["b_res"])

    # (N*Lout, C_out) -> (N, C_out, Lout)  (PyTorch layout)
    return jnp.transpose(out2d.reshape(n, lout, c_out), (0, 2, 1))


# ---------------------------------------------------------------------------
# Pure-JAX reference (lax.conv_general_dilated) for correctness check
# ---------------------------------------------------------------------------
def ref_down(x, params, *, k, factor, dilations=(1, 2, 4, 8)):
    def conv1d(inp, w_kio, b, stride=1, dilation=1, pad_left=0):
        w = jnp.transpose(w_kio, (2, 1, 0))           # (K, I, O) -> (O, I, K)
        y = lax.conv_general_dilated(
            inp, w, window_strides=(stride,), padding=[(pad_left, 0)],
            rhs_dilation=(dilation,), dimension_numbers=("NCH", "OIH", "NCH"))
        return y + b.reshape(1, -1, 1)

    def bnorm(y, g, be):
        mean = y.mean(axis=(0, 2), keepdims=True)
        var = ((y - mean) ** 2).mean(axis=(0, 2), keepdims=True)
        return (y - mean) / jnp.sqrt(var + _EPS) * g.reshape(1, -1, 1) + be.reshape(1, -1, 1)

    oldx = x
    h = conv1d(x, params["w_in"][None], params["b_in"][0])          # InConv (1x1)
    for i, d in enumerate(dilations):
        h = jax.nn.elu(h)
        h = conv1d(h, params["ws"][i], params["bs"][i][0],
                   dilation=d, pad_left=d * (k - 1))
        h = bnorm(h, params["gs"][i][0], params["betas"][i][0])
    n, c, length = h.shape
    pooled = h.reshape(n, c, length // factor, factor).mean(-1)      # AvgPool1d
    res = conv1d(oldx, params["w_res"], params["b_res"][0], stride=factor)
    return pooled + res


if __name__ == "__main__":
    N, C_IN, L = 2, 4, 32
    C_OUT, K_SIZE, FACTOR = 8, 3, 2

    key = jax.random.PRNGKey(0)
    kx, kp = jax.random.split(key)
    x = jax.random.normal(kx, (N, C_IN, L), jnp.float32)
    params = init_params(kp, C_IN, C_OUT, K_SIZE, FACTOR)

    out = jax.block_until_ready(down_forward(x, params, k=K_SIZE, factor=FACTOR))

    expected = jax.block_until_ready(ref_down(x, params, k=K_SIZE, factor=FACTOR))
    assert out.shape == (N, C_OUT, L // FACTOR), out.shape
    max_err = float(jnp.max(jnp.abs(out - expected)))
    assert max_err < 1e-3, f"mismatch vs reference: {max_err}"

    print("KERNEL_OK")
</pallas_src>

<mosaic_0001>
module attributes {stable_mosaic.version = 11 : i64} {
  func.func @down_kernel(%arg0: memref<64x4xf32, #tpu.memory_space<vmem>>, %arg1: memref<4x8xf32, #tpu.memory_space<vmem>>, %arg2: memref<1x8xf32, #tpu.memory_space<vmem>>, %arg3: memref<4x24x8xf32, #tpu.memory_space<vmem>>, %arg4: memref<4x1x8xf32, #tpu.memory_space<vmem>>, %arg5: memref<4x1x8xf32, #tpu.memory_space<vmem>>, %arg6: memref<8x8xf32, #tpu.memory_space<vmem>>, %arg7: memref<1x8xf32, #tpu.memory_space<vmem>>, %arg8: memref<32x8xf32, #tpu.memory_space<vmem>>, %arg9: memref<64x8xf32, #tpu.memory_space<vmem>>) attributes {dimension_semantics = [], scalar_prefetch = 0 : i64, scratch_operands = 1 : i64, tpu.core_type = #tpu.core_type<tc>} {
    %c0 = arith.constant 0 : index
    %c0_0 = arith.constant 0 : index
    %0 = vector.load %arg0[%c0, %c0_0] : memref<64x4xf32, #tpu.memory_space<vmem>>, vector<64x4xf32>
    %1 = tpu.iota {dimensions = array<i32: 0>} : vector<64x1xi32>
    %c32_i32 = arith.constant 32 : i32
    %c0_i32 = arith.constant 0 : i32
    %2 = arith.cmpi eq, %c32_i32, %c0_i32 : i32
    %c1_i32 = arith.constant 1 : i32
    %3 = arith.select %2, %c1_i32, %c32_i32 : i32
    %4 = vector.broadcast %3 : i32 to vector<64x1xi32>
    %5 = arith.remsi %1, %4 : vector<64x1xi32>
    %c0_i32_1 = arith.constant 0 : i32
    %6 = vector.broadcast %c0_i32_1 : i32 to vector<64x1xi32>
    %7 = arith.cmpi ne, %5, %6 : vector<64x1xi32>
    %c0_i32_2 = arith.constant 0 : i32
    %8 = vector.broadcast %c0_i32_2 : i32 to vector<64x1xi32>
    %9 = arith.cmpi slt, %5, %8 : vector<64x1xi32>
    %c0_i32_3 = arith.constant 0 : i32
    %10 = arith.cmpi slt, %3, %c0_i32_3 : i32
    %11 = vector.broadcast %10 : i1 to vector<64x1xi1>
    %12 = vector.broadcast %11 : vector<64x1xi1> to vector<64x1xi1>
    %13 = arith.xori %9, %12 : vector<64x1xi1>
    %14 = arith.andi %13, %7 : vector<64x1xi1>
    %15 = vector.broadcast %3 : i32 to vector<64x1xi32>
    %16 = arith.addi %5, %15 : vector<64x1xi32>
    %17 = arith.select %14, %16, %5 : vector<64x1xi1>, vector<64x1xi32>
    %c1_i32_4 = arith.constant 1 : i32
    %18 = vector.broadcast %c1_i32_4 : i32 to vector<64x1xi32>
    %19 = arith.cmpi sge, %17, %18 : vector<64x1xi32>
    %20 = arith.extui %19 : vector<64x1xi1> to vector<64x1xi32>
    %21 = arith.sitofp %20 : vector<64x1xi32> to vector<64x1xf32>
    %c2_i32 = arith.constant 2 : i32
    %22 = vector.broadcast %c2_i32 : i32 to vector<64x1xi32>
    %23 = arith.cmpi sge, %17, %22 : vector<64x1xi32>
    %24 = arith.extui %23 : vector<64x1xi1> to vector<64x1xi32>
    %25 = arith.sitofp %24 : vector<64x1xi32> to vector<64x1xf32>
    %c4_i32 = arith.constant 4 : i32
    %26 = vector.broadcast %c4_i32 : i32 to vector<64x1xi32>
    %27 = arith.cmpi sge, %17, %26 : vector<64x1xi32>
    %28 = arith.extui %27 : vector<64x1xi1> to vector<64x1xi32>
    %29 = arith.sitofp %28 : vector<64x1xi32> to vector<64x1xf32>
    %c8_i32 = arith.constant 8 : i32
    %30 = vector.broadcast %c8_i32 : i32 to vector<64x1xi32>
    %31 = arith.cmpi sge, %17, %30 : vector<64x1xi32>
    %32 = arith.extui %31 : vector<64x1xi1> to vector<64x1xi32>
    %33 = arith.sitofp %32 : vector<64x1xi32> to vector<64x1xf32>
    %c16_i32 = arith.constant 16 : i32
    %34 = vector.broadcast %c16_i32 : i32 to vector<64x1xi32>
    %35 = arith.cmpi sge, %17, %34 : vector<64x1xi32>
    %36 = arith.extui %35 : vector<64x1xi1> to vector<64x1xi32>
    %37 = arith.sitofp %36 : vector<64x1xi32> to vector<64x1xf32>
    %c0_5 = arith.constant 0 : index
    %c0_6 = arith.constant 0 : index
    %38 = vector.load %arg1[%c0_5, %c0_6] : memref<4x8xf32, #tpu.memory_space<vmem>>, vector<4x8xf32>
    %cst = arith.constant dense<0.000000e+00> : vector<64x8xf32>
    %39 = tpu.matmul %0, %38, %cst {dimension_numbers = #tpu.dot_dimension_numbers<[1], [0], [0], [1], [0, 0, 1, 1], [], []>} : vector<64x4xf32>, vector<4x8xf32>, vector<64x8xf32> -> vector<64x8xf32>
    %c0_7 = arith.constant 0 : index
    %c0_8 = arith.constant 0 : index
    %40 = vector.load %arg2[%c0_7, %c0_8] : memref<1x8xf32, #tpu.memory_space<vmem>>, vector<1x8xf32>
    %41 = vector.broadcast %40 : vector<1x8xf32> to vector<64x8xf32>
    %42 = arith.addf %39, %41 : vector<64x8xf32>
    %cst_9 = arith.constant 0.000000e+00 : f32
    %43 = vector.broadcast %cst_9 : f32 to vector<64x8xf32>
    %44 = arith.cmpf ogt, %42, %43 : vector<64x8xf32>
    %cst_10 = arith.constant 0.000000e+00 : f32
    %45 = vector.broadcast %cst_10 : f32 to vector<64x8xf32>
    %46 = arith.minimumf %42, %45 : vector<64x8xf32>
    %47 = math.exp %46 : vector<64x8xf32>
    %cst_11 = arith.constant 1.000000e+00 : f32
    %48 = vector.broadcast %cst_11 : f32 to vector<64x8xf32>
    %49 = arith.subf %47, %48 : vector<64x8xf32>
    %50 = arith.select %44, %42, %49 : vector<64x8xi1>, vector<64x8xf32>
    %c2_i32_12 = arith.constant 2 : i32
    %51 = tpu.dynamic_rotate %50 by %c2_i32_12 dim 0 : vector<64x8xf32>, i32 -> vector<64x8xf32>
    %52 = vector.broadcast %25 : vector<64x1xf32> to vector<64x8xf32>
    %53 = arith.mulf %51, %52 : vector<64x8xf32>
    %c1_i32_13 = arith.constant 1 : i32
    %54 = tpu.dynamic_rotate %50 by %c1_i32_13 dim 0 : vector<64x8xf32>, i32 -> vector<64x8xf32>
    %55 = vector.broadcast %21 : vector<64x1xf32> to vector<64x8xf32>
    %56 = arith.mulf %54, %55 : vector<64x8xf32>
    %57 = tpu.concatenate %53, %56, %50 in 1 : vector<64x8xf32>, vector<64x8xf32>, vector<64x8xf32> -> vector<64x24xf32>
    %c0_14 = arith.constant 0 : index
    %c0_15 = arith.constant 0 : index
    %c0_16 = arith.constant 0 : index
    %58 = vector.load %arg3[%c0_14, %c0_15, %c0_16] : memref<4x24x8xf32, #tpu.memory_space<vmem>>, vector<1x24x8xf32>
    %59 = vector.shape_cast %58 : vector<1x24x8xf32> to vector<24x8xf32>
    %cst_17 = arith.constant dense<0.000000e+00> : vector<64x8xf32>
    %60 = tpu.matmul %57, %59, %cst_17 {dimension_numbers = #tpu.dot_dimension_numbers<[1], [0], [0], [1], [0, 0, 1, 1], [], []>} : vector<64x24xf32>, vector<24x8xf32>, vector<64x8xf32> -> vector<64x8xf32>
    %cst_18 = arith.constant dense<0.000000e+00> : vector<8xf32>
    %61 = vector.multi_reduction <add>, %60, %cst_18 [0] : vector<64x8xf32> to vector<8xf32>
    %62 = vector.shape_cast %61 : vector<8xf32> to vector<1x8xf32>
    %cst_19 = arith.constant 1.562500e-02 : f32
    %63 = vector.broadcast %cst_19 : f32 to vector<1x8xf32>
    %64 = arith.mulf %62, %63 : vector<1x8xf32>
    %65 = vector.broadcast %64 : vector<1x8xf32> to vector<64x8xf32>
    %66 = arith.subf %60, %65 : vector<64x8xf32>
    %67 = arith.mulf %66, %66 : vector<64x8xf32>
    %cst_20 = arith.constant dense<0.000000e+00> : vector<8xf32>
    %68 = vector.multi_reduction <add>, %67, %cst_20 [0] : vector<64x8xf32> to vector<8xf32>
    %69 = vector.shape_cast %68 : vector<8xf32> to vector<1x8xf32>
    %cst_21 = arith.constant 1.562500e-02 : f32
    %70 = vector.broadcast %cst_21 : f32 to vector<1x8xf32>
    %71 = arith.mulf %69, %70 : vector<1x8xf32>
    %cst_22 = arith.constant 9.99999974E-6 : f32
    %72 = vector.broadcast %cst_22 : f32 to vector<1x8xf32>
    %73 = arith.addf %71, %72 : vector<1x8xf32>
    %74 = math.rsqrt %73 : vector<1x8xf32>
    %c0_23 = arith.constant 0 : index
    %c0_24 = arith.constant 0 : index
    %c0_25 = arith.constant 0 : index
    %75 = vector.load %arg4[%c0_23, %c0_24, %c0_25] : memref<4x1x8xf32, #tpu.memory_space<vmem>>, vector<1x1x8xf32>
    %76 = vector.shape_cast %75 : vector<1x1x8xf32> to vector<1x8xf32>
    %77 = arith.mulf %74, %76 : vector<1x8xf32>
    %78 = vector.broadcast %77 : vector<1x8xf32> to vector<64x8xf32>
    %79 = arith.mulf %66, %78 : vector<64x8xf32>
    %c0_26 = arith.constant 0 : index
    %c0_27 = arith.constant 0 : index
    %c0_28 = arith.constant 0 : index
    %80 = vector.load %arg5[%c0_26, %c0_27, %c0_28] : memref<4x1x8xf32, #tpu.memory_space<vmem>>, vector<1x1x8xf32>
    %81 = vector.shape_cast %80 : vector<1x1x8xf32> to vector<1x8xf32>
    %82 = vector.broadcast %81 : vector<1x8xf32> to vector<64x8xf32>
    %83 = arith.addf %79, %82 : vector<64x8xf32>
    %cst_29 = arith.constant 0.000000e+00 : f32
    %84 = vector.broadcast %cst_29 : f32 to vector<64x8xf32>
    %85 = arith.cmpf ogt, %83, %84 : vector<64x8xf32>
    %cst_30 = arith.constant 0.000000e+00 : f32
    %86 = vector.broadcast %cst_30 : f32 to vector<64x8xf32>
    %87 = arith.minimumf %83, %86 : vector<64x8xf32>
    %88 = math.exp %87 : vector<64x8xf32>
    %cst_31 = arith.constant 1.000000e+00 : f32
    %89 = vector.broadcast %cst_31 : f32 to vector<64x8xf32>
    %90 = arith.subf %88, %89 : vector<64x8xf32>
    %91 = arith.select %85, %83, %90 : vector<64x8xi1>, vector<64x8xf32>
    %c4_i32_32 = arith.constant 4 : i32
    %92 = tpu.dynamic_rotate %91 by %c4_i32_32 dim 0 : vector<64x8xf32>, i32 -> vector<64x8xf32>
    %93 = vector.broadcast %29 : vector<64x1xf32> to vector<64x8xf32>
    %94 = arith.mulf %92, %93 : vector<64x8xf32>
    %c2_i32_33 = arith.constant 2 : i32
    %95 = tpu.dynamic_rotate %91 by %c2_i32_33 dim 0 : vector<64x8xf32>, i32 -> vector<64x8xf32>
    %96 = vector.broadcast %25 : vector<64x1xf32> to vector<64x8xf32>
    %97 = arith.mulf %95, %96 : vector<64x8xf32>
    %98 = tpu.concatenate %94, %97, %91 in 1 : vector<64x8xf32>, vector<64x8xf32>, vector<64x8xf32> -> vector<64x24xf32>
    %c1 = arith.constant 1 : index
    %c0_34 = arith.constant 0 : index
    %c0_35 = arith.constant 0 : index
    %99 = vector.load %arg3[%c1, %c0_34, %c0_35] : memref<4x24x8xf32, #tpu.memory_space<vmem>>, vector<1x24x8xf32>
    %100 = vector.shape_cast %99 : vector<1x24x8xf32> to vector<24x8xf32>
    %cst_36 = arith.constant dense<0.000000e+00> : vector<64x8xf32>
    %101 = tpu.matmul %98, %100, %cst_36 {dimension_numbers = #tpu.dot_dimension_numbers<[1], [0], [0], [1], [0, 0, 1, 1], [], []>} : vector<64x24xf32>, vector<24x8xf32>, vector<64x8xf32> -> vector<64x8xf32>
    %cst_37 = arith.constant dense<0.000000e+00> : vector<8xf32>
    %102 = vector.multi_reduction <add>, %101, %cst_37 [0] : vector<64x8xf32> to vector<8xf32>
    %103 = vector.shape_cast %102 : vector<8xf32> to vector<1x8xf32>
    %cst_38 = arith.constant 1.562500e-02 : f32
    %104 = vector.broadcast %cst_38 : f32 to vector<1x8xf32>
    %105 = arith.mulf %103, %104 : vector<1x8xf32>
    %106 = vector.broadcast %105 : vector<1x8xf32> to vector<64x8xf32>
    %107 = arith.subf %101, %106 : vector<64x8xf32>
    %108 = arith.mulf %107, %107 : vector<64x8xf32>
    %cst_39 = arith.constant dense<0.000000e+00> : vector<8xf32>
    %109 = vector.multi_reduction <add>, %108, %cst_39 [0] : vector<64x8xf32> to vector<8xf32>
    %110 = vector.shape_cast %109 : vector<8xf32> to vector<1x8xf32>
    %cst_40 = arith.constant 1.562500e-02 : f32
    %111 = vector.broadcast %cst_40 : f32 to vector<1x8xf32>
    %112 = arith.mulf %110, %111 : vector<1x8xf32>
    %cst_41 = arith.constant 9.99999974E-6 : f32
    %113 = vector.broadcast %cst_41 : f32 to vector<1x8xf32>
    %114 = arith.addf %112, %113 : vector<1x8xf32>
    %115 = math.rsqrt %114 : vector<1x8xf32>
    %c1_42 = arith.constant 1 : index
    %c0_43 = arith.constant 0 : index
    %c0_44 = arith.constant 0 : index
    %116 = vector.load %arg4[%c1_42, %c0_43, %c0_44] : memref<4x1x8xf32, #tpu.memory_space<vmem>>, vector<1x1x8xf32>
    %117 = vector.shape_cast %116 : vector<1x1x8xf32> to vector<1x8xf32>
    %118 = arith.mulf %115, %117 : vector<1x8xf32>
    %119 = vector.broadcast %118 : vector<1x8xf32> to vector<64x8xf32>
    %120 = arith.mulf %107, %119 : vector<64x8xf32>
    %c1_45 = arith.constant 1 : index
    %c0_46 = arith.constant 0 : index
    %c0_47 = arith.constant 0 : index
    %121 = vector.load %arg5[%c1_45, %c0_46, %c0_47] : memref<4x1x8xf32, #tpu.memory_space<vmem>>, vector<1x1x8xf32>
    %122 = vector.shape_cast %121 : vector<1x1x8xf32> to vector<1x8xf32>
    %123 = vector.broadcast %122 : vector<1x8xf32> to vector<64x8xf32>
    %124 = arith.addf %120, %123 : vector<64x8xf32>
    %cst_48 = arith.constant 0.000000e+00 : f32
    %125 = vector.broadcast %cst_48 : f32 to vector<64x8xf32>
    %126 = arith.cmpf ogt, %124, %125 : vector<64x8xf32>
    %cst_49 = arith.constant 0.000000e+00 : f32
    %127 = vector.broadcast %cst_49 : f32 to vector<64x8xf32>
    %128 = arith.minimumf %124, %127 : vector<64x8xf32>
    %129 = math.exp %128 : vector<64x8xf32>
    %cst_50 = arith.constant 1.000000e+00 : f32
    %130 = vector.broadcast %cst_50 : f32 to vector<64x8xf32>
    %131 = arith.subf %129, %130 : vector<64x8xf32>
    %132 = arith.select %126, %124, %131 : vector<64x8xi1>, vector<64x8xf32>
    %c8_i32_51 = arith.constant 8 : i32
    %133 = tpu.dynamic_rotate %132 by %c8_i32_51 dim 0 : vector<64x8xf32>, i32 -> vector<64x8xf32>
    %134 = vector.broadcast %33 : vector<64x1xf32> to vector<64x8xf32>
    %135 = arith.mulf %133, %134 : vector<64x8xf32>
    %c4_i32_52 = arith.constant 4 : i32
    %136 = tpu.dynamic_rotate %132 by %c4_i32_52 dim 0 : vector<64x8xf32>, i32 -> vector<64x8xf32>
    %137 = vector.broadcast %29 : vector<64x1xf32> to vector<64x8xf32>
    %138 = arith.mulf %136, %137 : vector<64x8xf32>
    %139 = tpu.concatenate %135, %138, %132 in 1 : vector<64x8xf32>, vector<64x8xf32>, vector<64x8xf32> -> vector<64x24xf32>
    %c2 = arith.constant 2 : index
    %c0_53 = arith.constant 0 : index
    %c0_54 = arith.constant 0 : index
    %140 = vector.load %arg3[%c2, %c0_53, %c0_54] : memref<4x24x8xf32, #tpu.memory_space<vmem>>, vector<1x24x8xf32>
    %141 = vector.shape_cast %140 : vector<1x24x8xf32> to vector<24x8xf32>
    %cst_55 = arith.constant dense<0.000000e+00> : vector<64x8xf32>
    %142 = tpu.matmul %139, %141, %cst_55 {dimension_numbers = #tpu.dot_dimension_numbers<[1], [0], [0], [1], [0, 0, 1, 1], [], []>} : vector<64x24xf32>, vector<24x8xf32>, vector<64x8xf32> -> vector<64x8xf32>
    %cst_56 = arith.constant dense<0.000000e+00> : vector<8xf32>
    %143 = vector.multi_reduction <add>, %142, %cst_56 [0] : vector<64x8xf32> to vector<8xf32>
    %144 = vector.shape_cast %143 : vector<8xf32> to vector<1x8xf32>
    %cst_57 = arith.constant 1.562500e-02 : f32
    %145 = vector.broadcast %cst_57 : f32 to vector<1x8xf32>
    %146 = arith.mulf %144, %145 : vector<1x8xf32>
    %147 = vector.broadcast %146 : vector<1x8xf32> to vector<64x8xf32>
    %148 = arith.subf %142, %147 : vector<64x8xf32>
    %149 = arith.mulf %148, %148 : vector<64x8xf32>
    %cst_58 = arith.constant dense<0.000000e+00> : vector<8xf32>
    %150 = vector.multi_reduction <add>, %149, %cst_58 [0] : vector<64x8xf32> to vector<8xf32>
    %151 = vector.shape_cast %150 : vector<8xf32> to vector<1x8xf32>
    %cst_59 = arith.constant 1.562500e-02 : f32
    %152 = vector.broadcast %cst_59 : f32 to vector<1x8xf32>
    %153 = arith.mulf %151, %152 : vector<1x8xf32>
    %cst_60 = arith.constant 9.99999974E-6 : f32
    %154 = vector.broadcast %cst_60 : f32 to vector<1x8xf32>
    %155 = arith.addf %153, %154 : vector<1x8xf32>
    %156 = math.rsqrt %155 : vector<1x8xf32>
    %c2_61 = arith.constant 2 : index
    %c0_62 = arith.constant 0 : index
    %c0_63 = arith.constant 0 : index
    %157 = vector.load %arg4[%c2_61, %c0_62, %c0_63] : memref<4x1x8xf32, #tpu.memory_space<vmem>>, vector<1x1x8xf32>
    %158 = vector.shape_cast %157 : vector<1x1x8xf32> to vector<1x8xf32>
    %159 = arith.mulf %156, %158 : vector<1x8xf32>
    %160 = vector.broadcast %159 : vector<1x8xf32> to vector<64x8xf32>
    %161 = arith.mulf %148, %160 : vector<64x8xf32>
    %c2_64 = arith.constant 2 : index
    %c0_65 = arith.constant 0 : index
    %c0_66 = arith.constant 0 : index
    %162 = vector.load %arg5[%c2_64, %c0_65, %c0_66] : memref<4x1x8xf32, #tpu.memory_space<vmem>>, vector<1x1x8xf32>
    %163 = vector.shape_cast %162 : vector<1x1x8xf32> to vector<1x8xf32>
    %164 = vector.broadcast %163 : vector<1x8xf32> to vector<64x8xf32>
    %165 = arith.addf %161, %164 : vector<64x8xf32>
    %cst_67 = arith.constant 0.000000e+00 : f32
    %166 = vector.broadcast %cst_67 : f32 to vector<64x8xf32>
    %167 = arith.cmpf ogt, %165, %166 : vector<64x8xf32>
    %cst_68 = arith.constant 0.000000e+00 : f32
    %168 = vector.broadcast %cst_68 : f32 to vector<64x8xf32>
    %169 = arith.minimumf %165, %168 : vector<64x8xf32>
    %170 = math.exp %169 : vector<64x8xf32>
    %cst_69 = arith.constant 1.000000e+00 : f32
    %171 = vector.broadcast %cst_69 : f32 to vector<64x8xf32>
    %172 = arith.subf %170, %171 : vector<64x8xf32>
    %173 = arith.select %167, %165, %172 : vector<64x8xi1>, vector<64x8xf32>
    %c16_i32_70 = arith.constant 16 : i32
    %174 = tpu.dynamic_rotate %173 by %c16_i32_70 dim 0 : vector<64x8xf32>, i32 -> vector<64x8xf32>
    %175 = vector.broadcast %37 : vector<64x1xf32> to vector<64x8xf32>
    %176 = arith.mulf %174, %175 : vector<64x8xf32>
    %c8_i32_71 = arith.constant 8 : i32
    %177 = tpu.dynamic_rotate %173 by %c8_i32_71 dim 0 : vector<64x8xf32>, i32 -> vector<64x8xf32>
    %178 = vector.broadcast %33 : vector<64x1xf32> to vector<64x8xf32>
    %179 = arith.mulf %177, %178 : vector<64x8xf32>
    %180 = tpu.concatenate %176, %179, %173 in 1 : vector<64x8xf32>, vector<64x8xf32>, vector<64x8xf32> -> vector<64x24xf32>
    %c3 = arith.constant 3 : index
    %c0_72 = arith.constant 0 : index
    %c0_73 = arith.constant 0 : index
    %181 = vector.load %arg3[%c3, %c0_72, %c0_73] : memref<4x24x8xf32, #tpu.memory_space<vmem>>, vector<1x24x8xf32>
    %182 = vector.shape_cast %181 : vector<1x24x8xf32> to vector<24x8xf32>
    %cst_74 = arith.constant dense<0.000000e+00> : vector<64x8xf32>
    %183 = tpu.matmul %180, %182, %cst_74 {dimension_numbers = #tpu.dot_dimension_numbers<[1], [0], [0], [1], [0, 0, 1, 1], [], []>} : vector<64x24xf32>, vector<24x8xf32>, vector<64x8xf32> -> vector<64x8xf32>
    %cst_75 = arith.constant dense<0.000000e+00> : vector<8xf32>
    %184 = vector.multi_reduction <add>, %183, %cst_75 [0] : vector<64x8xf32> to vector<8xf32>
    %185 = vector.shape_cast %184 : vector<8xf32> to vector<1x8xf32>
    %cst_76 = arith.constant 1.562500e-02 : f32
    %186 = vector.broadcast %cst_76 : f32 to vector<1x8xf32>
    %187 = arith.mulf %185, %186 : vector<1x8xf32>
    %188 = vector.broadcast %187 : vector<1x8xf32> to vector<64x8xf32>
    %189 = arith.subf %183, %188 : vector<64x8xf32>
    %190 = arith.mulf %189, %189 : vector<64x8xf32>
    %cst_77 = arith.constant dense<0.000000e+00> : vector<8xf32>
    %191 = vector.multi_reduction <add>, %190, %cst_77 [0] : vector<64x8xf32> to vector<8xf32>
    %192 = vector.shape_cast %191 : vector<8xf32> to vector<1x8xf32>
    %cst_78 = arith.constant 1.562500e-02 : f32
    %193 = vector.broadcast %cst_78 : f32 to vector<1x8xf32>
    %194 = arith.mulf %192, %193 : vector<1x8xf32>
    %cst_79 = arith.constant 9.99999974E-6 : f32
    %195 = vector.broadcast %cst_79 : f32 to vector<1x8xf32>
    %196 = arith.addf %194, %195 : vector<1x8xf32>
    %197 = math.rsqrt %196 : vector<1x8xf32>
    %c3_80 = arith.constant 3 : index
    %c0_81 = arith.constant 0 : index
    %c0_82 = arith.constant 0 : index
    %198 = vector.load %arg4[%c3_80, %c0_81, %c0_82] : memref<4x1x8xf32, #tpu.memory_space<vmem>>, vector<1x1x8xf32>
    %199 = vector.shape_cast %198 : vector<1x1x8xf32> to vector<1x8xf32>
    %200 = arith.mulf %197, %199 : vector<1x8xf32>
    %201 = vector.broadcast %200 : vector<1x8xf32> to vector<64x8xf32>
    %202 = arith.mulf %189, %201 : vector<64x8xf32>
    %c3_83 = arith.constant 3 : index
    %c0_84 = arith.constant 0 : index
    %c0_85 = arith.constant 0 : index
    %203 = vector.load %arg5[%c3_83, %c0_84, %c0_85] : memref<4x1x8xf32, #tpu.memory_space<vmem>>, vector<1x1x8xf32>
    %204 = vector.shape_cast %203 : vector<1x1x8xf32> to vector<1x8xf32>
    %205 = vector.broadcast %204 : vector<1x8xf32> to vector<64x8xf32>
    %206 = arith.addf %202, %205 : vector<64x8xf32>
    %c63_i32 = arith.constant 63 : i32
    %207 = tpu.dynamic_rotate %206 by %c63_i32 dim 0 : vector<64x8xf32>, i32 -> vector<64x8xf32>
    %208 = arith.addf %206, %207 : vector<64x8xf32>
    %c0_86 = arith.constant 0 : index
    %c0_87 = arith.constant 0 : index
    %209 = vector.load %arg9[%c0_86, %c0_87] : memref<64x8xf32, #tpu.memory_space<vmem>>, vector<64x8xf32>
    tpu.vector_store %arg9[%c0_86, %c0_87], %208 {strides = array<i32>} : memref<64x8xf32, #tpu.memory_space<vmem>>, vector<64x8xf32>,
    %c0_88 = arith.constant 0 : index
    %c0_89 = arith.constant 0 : index
    %210 = tpu.strided_load %arg9[%c0_88, %c0_89] {strides = array<i32: 2, 1>} : memref<64x8xf32, #tpu.memory_space<vmem>>, vector<32x8xf32>
    %cst_90 = arith.constant 5.000000e-01 : f32
    %211 = vector.broadcast %cst_90 : f32 to vector<32x8xf32>
    %212 = arith.mulf %210, %211 : vector<32x8xf32>
    %c0_91 = arith.constant 0 : index
    %c0_92 = arith.constant 0 : index
    %213 = tpu.strided_load %arg0[%c0_91, %c0_92] {strides = array<i32: 2, 1>} : memref<64x4xf32, #tpu.memory_space<vmem>>, vector<32x4xf32>
    %c1_93 = arith.constant 1 : index
    %c0_94 = arith.constant 0 : index
    %214 = tpu.strided_load %arg0[%c1_93, %c0_94] {strides = array<i32: 2, 1>} : memref<64x4xf32, #tpu.memory_space<vmem>>, vector<32x4xf32>
    %215 = tpu.concatenate %213, %214 in 1 : vector<32x4xf32>, vector<32x4xf32> -> vector<32x8xf32>
    %c0_95 = arith.constant 0 : index
    %c0_96 = arith.constant 0 : index
    %216 = vector.load %arg6[%c0_95, %c0_96] : memref<8x8xf32, #tpu.memory_space<vmem>>, vector<8x8xf32>
    %cst_97 = arith.constant dense<0.000000e+00> : vector<32x8xf32>
    %217 = tpu.matmul %215, %216, %cst_97 {dimension_numbers = #tpu.dot_dimension_numbers<[1], [0], [0], [1], [0, 0, 1, 1], [], []>} : vector<32x8xf32>, vector<8x8xf32>, vector<32x8xf32> -> vector<32x8xf32>
    %c0_98 = arith.constant 0 : index
    %c0_99 = arith.constant 0 : index
    %218 = vector.load %arg7[%c0_98, %c0_99] : memref<1x8xf32, #tpu.memory_space<vmem>>, vector<1x8xf32>
    %219 = vector.broadcast %218 : vector<1x8xf32> to vector<32x8xf32>
    %220 = arith.addf %217, %219 : vector<32x8xf32>
    %221 = arith.addf %212, %220 : vector<32x8xf32>
    %c0_100 = arith.constant 0 : index
    %c0_101 = arith.constant 0 : index
    %222 = vector.load %arg8[%c0_100, %c0_101] : memref<32x8xf32, #tpu.memory_space<vmem>>, vector<32x8xf32>
    tpu.vector_store %arg8[%c0_100, %c0_101], %221 {strides = array<i32>} : memref<32x8xf32, #tpu.memory_space<vmem>>, vector<32x8xf32>,
    return
  }
}

</mosaic_0001>

<bundles_post_ra>
// kernel: tpu_custom_call.1
= control target key start
LH: loop header
LB: loop body
LE: loop exit
PB: predicated region body
PF: predicated region fallthrough
CT: control target
= control target key end

     0   :  { %vm292_vm0 = vcmask 1043456   ;;  %vm267_vm1 = vcmask 31744   ;;  %v37_v26 = vlaneseq  ;;  %s1985_s24 = smov 16   ;;  %vm499_vm15 = vcmask 64512   ;;  %s1987_s18 = smov 4   ;;  %s2694_s1 = inlined_call_operand.vmem [shape: f32[4,8], index: 1, kind: input, shape index: {}]   ;;  %s2695_s0 = inlined_call_operand.vmem [shape: f32[64,4], index: 0, kind: input, shape index: {}]   ;;  %s2696_s2 = inlined_call_operand.vmem [shape: f32[1,8], index: 2, kind: input, shape index: {}]   ;;  %s2697_s3 = inlined_call_operand.vmem [shape: f32[4,24,8], index: 3, kind: input, shape index: {}]   ;;  %s2698_s5 = inlined_call_operand.vmem [shape: f32[4,1,8], index: 5, kind: input, shape index: {}]   ;;  %s2699_s4 = inlined_call_operand.vmem [shape: f32[4,1,8], index: 4, kind: input, shape index: {}]   ;;  %s2700_s6 = inlined_call_operand.vmem [shape: f32[8,8], index: 6, kind: input, shape index: {}]   ;;  %s2701_s7 = inlined_call_operand.vmem [shape: f32[1,8], index: 7, kind: input, shape index: {}]   ;;  %s2702_s8 = inlined_call_operand.vmem [shape: f32[32,8], index: 8, kind: output, shape index: {}]  }
   0x1   :  { %v262_v0 = vld [vmem:[%s2694_s1] sm:$0xf]  ;;  %v30_v3 = vld [vmem:[%s2695_s0 + $0x8] sm:$0xff]  ;;  %v31_v5 = vld [vmem:[%s2695_s0 + $0x10] sm:$0xff] }
   0x2   :  { %v29_v1 = vld [vmem:[%s2695_s0] sm:$0xff]  ;;  %1799 = vmatpush.msk.msra.mxu0 %vm292_vm0, %v262_v0  ;;  %1898 = vmatpush.msk.msra.mxu2 %vm292_vm0, %v262_v0  ;;  %v34_v4 = vld [vmem:[%s2695_s0 + $0x28] sm:$0xff]  ;;  %v35_v6 = vld [vmem:[%s2695_s0 + $0x30] sm:$0xff]  ;;  %v2078_v32 = vshrl.u32 %v37_v26, 7  ;;  %vm520_vm0 = vcmask 195584  }
   0x3   :  { %v33_v2 = vld [vmem:[%s2695_s0 + $0x20] sm:$0xff]  ;;  %1800 = vmatmul.msk.f32.vlgmr.msra.gmra.mxu0 %vm267_vm1, %v29_v1  ;;  %v32_v7 = vld [vmem:[%s2695_s0 + $0x18] sm:$0xff] }
   0x4   :  { %1804 = vmatmul.msk.f32.vlgmr.msra.gmra.mxu2 %vm267_vm1, %v33_v2  ;;  %v36_v8 = vld [vmem:[%s2695_s0 + $0x38] sm:$0xff]  ;;  %v2071_v9 = vld [vmem:[%s2696_s2] ss:$0 sm:$0xff]  ;;  %vm418_vm4 = vcmp.lt.s32.totalorder %v2078_v32, 1  ;;  %vm393_vm5 = vcmp.lt.s32.totalorder %v2078_v32, 2  ;;  %s1984_s2 = smov 8  }
   0xb   :  { %1801 = vmatmul.msk.f32.gmra.mxu0 %vm267_vm1, %v30_v3 }
   0xc   :  { %1805 = vmatmul.msk.f32.gmra.mxu2 %vm267_vm1, %v34_v4  ;;  %v42_v4 = vadd.s32 32, %v2078_v32 }
  0x13   :  { %1802 = vmatmul.msk.f32.gmra.mxu0 %vm267_vm1, %v31_v5 }
  0x14   :  { %1806 = vmatmul.msk.f32.gmra.mxu2 %vm267_vm1, %v35_v6 }
  0x1b   :  { %1803 = vmatmul.msk.f32.gmra.mxu0 %vm267_vm1, %v32_v7 }
  0x1c   :  { %1807 = vmatmul.msk.f32.gmra.mxu2 %vm267_vm1, %v36_v8 }
  0x80   :  { %v313_v10 = vpop.f32.mrf.mxu0 }
  0x81   :  { %v314_v11 = vadd.f32 %v2071_v9, %v313_v10 }
  0x83   :  { %v345_v12 = vmin.f32 %v314_v11, 0.0  ;;  %vm337_vm2 = vcmp.gt.f32.partialorder %v314_v11, 0.0 }
  0x85   :  { %v353_v13 = vmul.f32 1.442695, %v345_v12 }
  0x87   :  { %v325_v14 = vpop.f32.mrf.mxu2  ;;  %1912 = vpow2.f32 %v353_v13 }
  0x88   :  { %v326_v15 = vadd.f32 %v2071_v9, %v325_v14  ;;  %v316_v16 = vpop.f32.mrf.mxu0  ;;  %v2119_v14 = vand.u32 31, %v42_v4 }
  0x89   :  { %v317_v18 = vadd.f32 %v2071_v9, %v316_v16 }
  0x8a   :  { %v349_v17 = vmin.f32 %v326_v15, 0.0  ;;  %vm341_vm6 = vcmp.gt.f32.partialorder %v326_v15, 0.0  ;;  %vm146_vm11 = vcmp.ge.s32.totalorder %v2119_v14, 1 }
  0x8b   :  { %v346_v19 = vmin.f32 %v317_v18, 0.0  ;;  %vm338_vm3 = vcmp.gt.f32.partialorder %v317_v18, 0.0 }
  0x8c   :  { %v361_v20 = vmul.f32 1.442695, %v349_v17  ;;  %v2122_v17 = vand.u32 31, %v2078_v32 }
  0x8d   :  { %v355_v21 = vmul.f32 1.442695, %v346_v19  ;;  %v1913_v22 = vpop.eup %1912 }
  0x8e   :  { %v1808_v27 = vadd.f32 -1.0, %v1913_v22  ;;  %vm142_vm12 = vcmp.ge.s32.totalorder %v2122_v17, 1  ;;  %vm166_vm14 = vcmp.ge.s32.totalorder %v2122_v17, 2 }
  0x8f   :  { %v328_v23 = vpop.f32.mrf.mxu2  ;;  %1914 = vpow2.f32 %v355_v21 }
  0x90   :  { %v329_v24 = vadd.f32 %v2071_v9, %v328_v23  ;;  %1916 = vpow2.f32 %v361_v20  ;;  %v319_v25 = vpop.f32.mrf.mxu0  ;;  %v2080_v34 = vsel %vm337_vm2, %v314_v11, %v1808_v27  ;;  %v1986_v27 = vmov 0.0  }
  0x91   :  { %v320_v29 = vadd.f32 %v2071_v9, %v319_v25  ;;  %v385_v39 = vrot.slane %v2080_v34, 6  ;;  %v410_v43 = vrot.slane %v2080_v34, 7  ;;  %vm508_vm2 = vcmask 130048  }
  0x92   :  { %v350_v28 = vmin.f32 %v329_v24, 0.0  ;;  %vm342_vm7 = vcmp.gt.f32.partialorder %v329_v24, 0.0 }
  0x93   :  { %v347_v31 = vmin.f32 %v320_v29, 0.0  ;;  %vm339_vm8 = vcmp.gt.f32.partialorder %v320_v29, 0.0 }
  0x94   :  { %v363_v30 = vmul.f32 1.442695, %v350_v28  ;;  %v1794_v28 = vsel %vm146_vm11, 1.0, %v1986_v27 }
  0x95   :  { %v1915_v33 = vpop.eup %1914  ;;  %v357_v35 = vmul.f32 1.442695, %v347_v31  ;;  %v1793_v31 = vsel %vm142_vm12, 1.0, %v1986_v27 }
  0x96   :  { %1918 = vpow2.f32 %v363_v30  ;;  %v1917_v36 = vpop.eup %1916  ;;  %v1809_v37 = vadd.f32 -1.0, %v1915_v33 }
  0x97   :  { %v331_v38 = vpop.f32.mrf.mxu2  ;;  %1920 = vpow2.f32 %v357_v35  ;;  %v1812_v44 = vadd.f32 -1.0, %v1917_v36 }
  0x98   :  { %v332_v40 = vadd.f32 %v2071_v9, %v331_v38  ;;  %v378_v41 = vsel %vm338_vm3, %v317_v18, %v1809_v37  ;;  %v322_v42 = vpop.f32.mrf.mxu0  ;;  %vm170_vm3 = vcmp.ge.s32.totalorder %v2119_v14, 2 }
  0x99   :  { %v386_v45 = vrot.slane %v378_v41, 6  ;;  %v323_v47 = vadd.f32 %v2071_v9, %v322_v42  ;;  %v411_v48 = vrot.slane %v378_v41, 7  ;;  %v2098_v56 = vsel %vm341_vm6, %v326_v15, %v1812_v44 }
  0x9a   :  { %v351_v46 = vmin.f32 %v332_v40, 0.0  ;;  %v389_v63 = vrot.slane %v2098_v56, 6  ;;  %vm343_vm9 = vcmp.gt.f32.partialorder %v332_v40, 0.0  ;;  %v414_v25 = vrot.slane %v2098_v56, 7 }
  0x9b   :  { %v348_v51 = vmin.f32 %v323_v47, 0.0  ;;  %v2092_v52 = vsel %vm393_vm5, %v385_v39, %v386_v45  ;;  %v425_v54 = vsel %vm418_vm4, %v410_v43, %v411_v48  ;;  %vm340_vm10 = vcmp.gt.f32.partialorder %v323_v47, 0.0 }
  0x9c   :  { %v1919_v49 = vpop.eup %1918  ;;  %v365_v50 = vmul.f32 1.442695, %v351_v46  ;;  %445 = vrot.lane.b32.xlu1 %v425_v54, %s1984_s2  ;;  %v518_v46 = vld [vmem:[%s2697_s3 + $0x8] sm:$0xff] }
  0x9d   :  { %v1813_v53 = vadd.f32 -1.0, %v1919_v49  ;;  %v1921_v55 = vpop.eup %1920  ;;  %v359_v57 = vmul.f32 1.442695, %v348_v51  ;;  %v2189_v51 = vsel %vm166_vm14, 1.0, %v1986_v27 }
  0x9e   :  { %1922 = vpow2.f32 %v365_v50  ;;  %v1810_v59 = vadd.f32 -1.0, %v1921_v55 }
  0x9f   :  { %v2101_v58 = vsel %vm342_vm7, %v329_v24, %v1813_v53  ;;  %v334_v60 = vpop.f32.mrf.mxu2  ;;  %1924 = vpow2.f32 %v359_v57 }
  0xa0   :  { %v390_v61 = vrot.slane %v2101_v58, 6  ;;  %v335_v62 = vadd.f32 %v2071_v9, %v334_v60  ;;  %v379_v0 = vsel %vm339_vm8, %v320_v29, %v1810_v59  ;;  %v415_v35 = vrot.slane %v2101_v58, 7 }
  0xa1   :  { %v387_v1 = vrot.slane %v379_v0, 6  ;;  %v412_v3 = vrot.slane %v379_v0, 7  ;;  %vm736_vm8 = vcmp.lt.s32.totalorder %v2078_v32, 4 }
  0xa2   :  { %v352_v2 = vmin.f32 %v335_v62, 0.0  ;;  %v2109_v5 = vsel %vm393_vm5, %v389_v63, %v390_v61  ;;  %vm344_vm13 = vcmp.gt.f32.partialorder %v335_v62, 0.0  ;;  %v421_v42 = vsel %vm418_vm4, %v414_v25, %v415_v35 }
  0xa3   :  { %v424_v8 = vsel %vm418_vm4, %v411_v48, %v412_v3  ;;  %v2115_v9 = vsel %vm393_vm5, %v386_v45, %v387_v1 }
  0xa4   :  { %v1923_v6 = vpop.eup %1922  ;;  %v367_v7 = vmul.f32 1.442695, %v352_v2  ;;  %447 = vrot.lane.b32.xlu2 %v424_v8, %s1984_s2  ;;  %477 = vrot.lane.b32.xlu1 %v378_v41, %s1985_s24 }
  0xa5   :  { %v1814_v10 = vadd.f32 -1.0, %v1923_v6  ;;  %v1925_v11 = vpop.eup %1924 }
  0xa6   :  { %1926 = vpow2.f32 %v367_v7  ;;  %v1811_v13 = vadd.f32 -1.0, %v1925_v11 }
  0xa7   :  { %v383_v12 = vsel %vm343_vm9, %v332_v40, %v1814_v10  ;;  %v2211_v10 = vsel %vm170_vm3, 1.0, %v1986_v27 }
  0xa8   :  { %v391_v15 = vrot.slane %v383_v12, 6  ;;  %v380_v16 = vsel %vm340_vm10, %v323_v47, %v1811_v13  ;;  %v517_v47 = vld [vmem:[%s2697_s3] sm:$0xff] }
  0xa9   :  { %v388_v18 = vrot.slane %v380_v16, 6  ;;  %v413_v21 = vrot.slane %v380_v16, 7 }
  0xaa   :  { %v2126_v19 = vsel %vm393_vm5, %v390_v61, %v391_v15 }
  0xab   :  { %v2131_v22 = vsel %vm393_vm5, %v388_v18, %v389_v63  ;;  %v2135_v23 = vsel %vm393_vm5, %v387_v1, %v388_v18  ;;  %v422_v30 = vsel %vm418_vm4, %v413_v21, %v414_v25  ;;  %v423_v44 = vsel %vm418_vm4, %v412_v3, %v413_v21 }
  0xac   :  { %v1927_v20 = vpop.eup %1926  ;;  %479 = vrot.lane.b32.xlu2 %v379_v0, %s1985_s24  ;;  %481 = vrot.lane.b32.xlu1 %v380_v16, %s1985_s24  ;;  %v431_v40 = vmul.f32 %v1794_v28, %v422_v30  ;;  %v406_v11 = vmul.f32 %v2211_v10, %v2131_v22 }
  0xad   :  { %v1815_v24 = vadd.f32 -1.0, %v1927_v20 }
  0xaf   :  { %v384_v26 = vsel %vm344_vm13, %v335_v62, %v1815_v24 }
  0xb0   :  { %v392_v29 = vrot.slane %v384_v26, 6  ;;  %v417_v33 = vrot.slane %v384_v26, 7 }
  0xb2   :  { %v426_v36 = vsel %vm418_vm4, %v417_v33, %v410_v43  ;;  %v401_v37 = vsel %vm393_vm5, %v392_v29, %v385_v39  ;;  %v394_v38 = vsel %vm393_vm5, %v391_v15, %v392_v29  ;;  %v416_v39 = vrot.slane %v383_v12, 7 }
  0xb3   :  { %v427_v41 = vmul.f32 %v1793_v31, %v426_v36  ;;  %v402_v53 = vmul.f32 %v2189_v51, %v401_v37 }
  0xb4   :  { %451 = vrot.lane.b32.xlu2 %v431_v40, %s1984_s2  ;;  %453 = vrot.lane.b32.xlu1 %v421_v42, %s1984_s2  ;;  %v420_v43 = vsel %vm418_vm4, %v415_v35, %v416_v39  ;;  %v419_v45 = vsel %vm418_vm4, %v416_v39, %v417_v33 }
  0xb5   :  { %443 = vrot.lane.b32.xlu0 %v427_v41, %s1984_s2 }
  0xbc   :  { %485 = vrot.lane.b32.xlu2 %v2101_v58, %s1985_s24  ;;  %489 = vrot.lane.b32.xlu1 %v384_v26, %s1985_s24 }
  0xbd   :  { %475 = vrot.lane.b32.xlu0 %v2080_v34, %s1985_s24  ;;  %v519_v34 = vld [vmem:[%s2697_s3 + $0x10] sm:$0xff] }
  0xbe   :  { %558 = vmatpush.msra.mxu1 %v519_v34  ;;  %1899 = vmatpush.msra.mxu3 %v519_v34 }
  0xc0   :  { %559 = vmatpush.msra.mxu1 %v518_v46  ;;  %1900 = vmatpush.msra.mxu3 %v518_v46 }
  0xc2   :  { %560 = vmatpush.msra.mxu1 %v517_v47  ;;  %1901 = vmatpush.msra.mxu3 %v517_v47 }
  0xc4   :  { %455 = vrot.lane.b32.xlu2 %v420_v43, %s1984_s2 }
  0xc5   :  { %449 = vrot.lane.b32.xlu0 %v423_v44, %s1984_s2 }
  0xcd   :  { %483 = vrot.lane.b32.xlu0 %v2098_v56, %s1985_s24 }
  0xd5   :  { %457 = vrot.lane.b32.xlu0 %v419_v45, %s1984_s2 }
  0xdd   :  { %487 = vrot.lane.b32.xlu0 %v383_v12, %s1985_s24 }
  0xfe   :  { %v448_v57 = vpop.permute.xlu2 %447 }
  0xff   :  { %v502_v0 = vsel %vm499_vm15, %v2115_v9, %v448_v57 }
 0x106   :  { %v480_v62 = vpop.permute.xlu2 %479 }
 0x107   :  { %v511_v2 = vsel %vm508_vm2, %v502_v0, %v480_v62 }
 0x10e   :  { %v446_v48 = vpop.permute.xlu1 %445  ;;  %v452_v4 = vpop.permute.xlu2 %451 }
 0x10f   :  { %v501_v59 = vsel %vm499_vm15, %v2092_v52, %v446_v48  ;;  %v504_v12 = vsel %vm499_vm15, %v406_v11, %v452_v4 }
 0x116   :  { %v478_v50 = vpop.permute.xlu1 %477  ;;  %v486_v15 = vpop.permute.xlu2 %485 }
 0x117   :  { %v510_v61 = vsel %vm508_vm2, %v501_v59, %v478_v50 }
 0x11e   :  { %v482_v58 = vpop.permute.xlu1 %481  ;;  %v456_v20 = vpop.permute.xlu2 %455 }
 0x126   :  { %v454_v63 = vpop.permute.xlu1 %453 }
 0x127   :  { %v444_v49 = vpop.permute.xlu0 %443  ;;  %v505_v16 = vsel %vm499_vm15, %v2109_v5, %v454_v63 }
 0x128   :  { %v500_v54 = vsel %vm499_vm15, %v402_v53, %v444_v49  ;;  %v514_v18 = vsel %vm508_vm2, %v505_v16, %v486_v15 }
 0x12e   :  { %v490_v6 = vpop.permute.xlu1 %489 }
 0x12f   :  { %v476_v55 = vpop.permute.xlu0 %475 }
 0x130   :  { %v509_v56 = vsel %vm508_vm2, %v500_v54, %v476_v55 }
 0x131   :  { %1816 = vmatmul.msk.f32.vlgmr.msra.gmra.mxu1 %vm520_vm0, %v509_v56 }
 0x137   :  { %v450_v60 = vpop.permute.xlu0 %449 }
 0x138   :  { %v503_v3 = vsel %vm499_vm15, %v2135_v23, %v450_v60  ;;  %v506_v23 = vsel %vm499_vm15, %v2126_v19, %v456_v20 }
 0x139   :  { %1817 = vmatmul.msk.f32.gmra.mxu1 %vm520_vm0, %v510_v61  ;;  %v512_v8 = vsel %vm508_vm2, %v503_v3, %v482_v58 }
 0x13f   :  { %v484_v1 = vpop.permute.xlu0 %483 }
 0x140   :  { %v513_v13 = vsel %vm508_vm2, %v504_v12, %v484_v1 }
 0x141   :  { %1818 = vmatmul.msk.f32.gmra.mxu1 %vm520_vm0, %v511_v2 }
 0x147   :  { %v458_v52 = vpop.permute.xlu0 %457 }
 0x148   :  { %v507_v7 = vsel %vm499_vm15, %v394_v38, %v458_v52 }
 0x149   :  { %1819 = vmatmul.msk.f32.gmra.mxu1 %vm520_vm0, %v512_v8  ;;  %v516_v9 = vsel %vm508_vm2, %v507_v7, %v490_v6 }
 0x14a   :  { %1823 = vmatmul.msk.f32.vlgmr.msra.gmra.mxu3 %vm520_vm0, %v516_v9 }
 0x14f   :  { %v488_v21 = vpop.permute.xlu0 %487 }
 0x150   :  { %v515_v22 = vsel %vm508_vm2, %v506_v23, %v488_v21 }
 0x151   :  { %1820 = vmatmul.msk.f32.gmra.mxu1 %vm520_vm0, %v513_v13 }
 0x159   :  { %1821 = vmatmul.msk.f32.gmra.mxu1 %vm520_vm0, %v514_v18 }
 0x161   :  { %1822 = vmatmul.msk.f32.gmra.mxu1 %vm520_vm0, %v515_v22 }
 0x1ae   :  { %v562_v24 = vpop.f32.mrf.mxu1 }
 0x1af   :  { %v586_v30 = vsel %vm499_vm15, %v562_v24, 0.0 }
 0x1b6   :  { %v565_v25 = vpop.f32.mrf.mxu1 }
 0x1b7   :  { %v587_v5 = vsel %vm499_vm15, %v565_v25, 0.0 }
 0x1b8   :  { %v588_v33 = vadd.f32 %v587_v5, %v586_v30 }
 0x1be   :  { %v568_v26 = vpop.f32.mrf.mxu1 }
 0x1bf   :  { %v589_v31 = vsel %vm499_vm15, %v568_v26, 0.0 }
 0x1c0   :  { %v590_v19 = vadd.f32 %v589_v31, %v588_v33 }
 0x1c6   :  { %v571_v28 = vpop.f32.mrf.mxu1 }
 0x1c7   :  { %v591_v36 = vsel %vm499_vm15, %v571_v28, 0.0 }
 0x1c8   :  { %v592_v38 = vadd.f32 %v591_v36, %v590_v19 }
 0x1cd   :  { %v583_v42 = vpop.f32.mrf.mxu3 }
 0x1ce   :  { %v574_v29 = vpop.f32.mrf.mxu1  ;;  %v599_v34 = vsel %vm499_vm15, %v583_v42, 0.0 }
 0x1cf   :  { %v593_v37 = vsel %vm499_vm15, %v574_v29, 0.0 }
 0x1d0   :  { %v594_v41 = vadd.f32 %v593_v37, %v592_v38 }
 0x1d6   :  { %v577_v35 = vpop.f32.mrf.mxu1 }
 0x1d7   :  { %v595_v40 = vsel %vm499_vm15, %v577_v35, 0.0 }
 0x1d8   :  { %v596_v39 = vadd.f32 %v595_v40, %v594_v41 }
 0x1de   :  { %v580_v43 = vpop.f32.mrf.mxu1 }
 0x1df   :  { %v597_v44 = vsel %vm499_vm15, %v580_v43, 0.0 }
 0x1e0   :  { %v598_v45 = vadd.f32 %v597_v44, %v596_v39  ;;  %v657_v39 = vld [vmem:[%s2699_s4] sm:$0x1] }
 0x1e2   :  { %v600_v46 = vadd.f32 %v599_v34, %v598_v45  ;;  %v1907_v34 = vld [vmem:[%s2698_s5] ss:$0 sm:$0xff] }
 0x1e4   :  { %v601_v47 = vrot.slane %v600_v46, 4 }
 0x1e6   :  { %v602_v48 = vadd.f32 %v601_v47, %v600_v46 }
 0x1e8   :  { %v603_v49 = vrot.slane %v602_v48, 2 }
 0x1ea   :  { %v604_v50 = vadd.f32 %v603_v49, %v602_v48 }
 0x1ec   :  { %v605_v53 = vrot.slane %v604_v50, 1 }
 0x1ee   :  { %v606_v54 = vadd.f32 %v605_v53, %v604_v50 }
 0x1f0   :  { %v607_v55 = vmul.f32 0.015625, %v606_v54 }
 0x1f2   :  { %v608_v56 = vsub.f32 %v562_v24, %v607_v55  ;;  %v609_v57 = vsub.f32 %v565_v25, %v607_v55  ;;  %v610_v58 = vsub.f32 %v568_v26, %v607_v55  ;;  %v611_v59 = vsub.f32 %v571_v28, %v607_v55 }
 0x1f3   :  { %v612_v60 = vsub.f32 %v574_v29, %v607_v55  ;;  %v613_v0 = vsub.f32 %v577_v35, %v607_v55  ;;  %v614_v4 = vsub.f32 %v580_v43, %v607_v55  ;;  %v615_v9 = vsub.f32 %v583_v42, %v607_v55 }
 0x1f4   :  { %v616_v61 = vmul.f32 %v608_v56, %v608_v56  ;;  %v617_v62 = vmul.f32 %v609_v57, %v609_v57  ;;  %v618_v63 = vmul.f32 %v610_v58, %v610_v58  ;;  %v619_v1 = vmul.f32 %v611_v59, %v611_v59 }
 0x1f5   :  { %v620_v6 = vmul.f32 %v612_v60, %v612_v60  ;;  %v621_v11 = vmul.f32 %v613_v0, %v613_v0  ;;  %v622_v15 = vmul.f32 %v614_v4, %v614_v4  ;;  %v623_v20 = vmul.f32 %v615_v9, %v615_v9 }
 0x1f6   :  { %v624_v2 = vsel %vm499_vm15, %v616_v61, 0.0  ;;  %v625_v3 = vsel %vm499_vm15, %v617_v62, 0.0  ;;  %v627_v7 = vsel %vm499_vm15, %v618_v63, 0.0  ;;  %v629_v12 = vsel %vm499_vm15, %v619_v1, 0.0 }
 0x1f7   :  { %v626_v52 = vadd.f32 %v625_v3, %v624_v2  ;;  %v631_v16 = vsel %vm499_vm15, %v620_v6, 0.0  ;;  %v633_v21 = vsel %vm499_vm15, %v621_v11, 0.0  ;;  %v635_v22 = vsel %vm499_vm15, %v622_v15, 0.0 }
 0x1f8   :  { %v637_v25 = vsel %vm499_vm15, %v623_v20, 0.0 }
 0x1f9   :  { %v628_v8 = vadd.f32 %v627_v7, %v626_v52 }
 0x1fb   :  { %v630_v13 = vadd.f32 %v629_v12, %v628_v8 }
 0x1fd   :  { %v632_v18 = vadd.f32 %v631_v16, %v630_v13 }
 0x1ff   :  { %v634_v23 = vadd.f32 %v633_v21, %v632_v18 }
 0x201   :  { %v636_v24 = vadd.f32 %v635_v22, %v634_v23 }
 0x203   :  { %v638_v26 = vadd.f32 %v637_v25, %v636_v24 }
 0x205   :  { %v639_v28 = vrot.slane %v638_v26, 4 }
 0x207   :  { %v640_v29 = vadd.f32 %v639_v28, %v638_v26 }
 0x209   :  { %v641_v5 = vrot.slane %v640_v29, 2 }
 0x20b   :  { %v642_v30 = vadd.f32 %v641_v5, %v640_v29 }
 0x20d   :  { %v643_v31 = vrot.slane %v642_v30, 1 }
 0x20f   :  { %v644_v33 = vadd.f32 %v643_v31, %v642_v30 }
 0x211   :  { %v645_v35 = vmul.f32 0.015625, %v644_v33 }
 0x213   :  { %v646_v36 = vadd.f32 1e-05, %v645_v35 }
 0x215   :  { %1928 = vrsqrt.f32 %v646_v36  ;;  %vm653_vm6 = vweird.f32 %v646_v36 }
 0x21b   :  { %v1929_v19 = vpop.eup %1928 }
 0x21c   :  { %v648_v37 = vmul.f32 %v1929_v19, %v646_v36  ;;  %vm654_vm4 = vweird.f32 %v1929_v19 }
 0x21d   :  { %vm655_vm7 = vmor %vm653_vm6, %vm654_vm4  ;;  %vm194_vm6 = vcmp.ge.s32.totalorder %v2119_v14, 4 }
 0x21e   :  { %v649_v38 = vmul.f32 %v1929_v19, %v648_v37 }
 0x220   :  { %v650_v40 = vmul.f32 0.5, %v649_v38 }
 0x222   :  { %v651_v41 = vsub.f32 1.5, %v650_v40 }
 0x224   :  { %v652_v42 = vmul.f32 %v1929_v19, %v651_v41 }
 0x226   :  { %v656_v43 = vsel %vm655_vm7, %v1929_v19, %v652_v42 }
 0x227   :  { %v658_v44 = vmul.f32 %v657_v39, %v656_v43 }
 0x229   :  { %v659_v45 = vperm.slane %v658_v44, 0 }
 0x22b   :  { %v664_v46 = vmul.f32 %v659_v45, %v612_v60  ;;  %v666_v47 = vmul.f32 %v659_v45, %v614_v4  ;;  %v667_v48 = vmul.f32 %v659_v45, %v615_v9  ;;  %v660_v49 = vmul.f32 %v659_v45, %v608_v56 }
 0x22c   :  { %v661_v50 = vmul.f32 %v659_v45, %v609_v57  ;;  %v662_v53 = vmul.f32 %v659_v45, %v610_v58  ;;  %v663_v54 = vmul.f32 %v659_v45, %v611_v59  ;;  %v665_v55 = vmul.f32 %v659_v45, %v613_v0 }
 0x22d   :  { %v672_v61 = vadd.f32 %v1907_v34, %v660_v49  ;;  %v679_v62 = vadd.f32 %v1907_v34, %v667_v48  ;;  %v2251_v3 = vadd.f32 %v1907_v34, %v664_v46  ;;  %v2255_v60 = vadd.f32 %v1907_v34, %v666_v47 }
 0x22e   :  { %v673_v63 = vadd.f32 %v1907_v34, %v661_v50  ;;  %v674_v1 = vadd.f32 %v1907_v34, %v662_v53  ;;  %v2249_v2 = vadd.f32 %v1907_v34, %v663_v54  ;;  %v2253_v7 = vadd.f32 %v1907_v34, %v665_v55 }
 0x22f   :  { %v688_v52 = vmin.f32 %v672_v61, 0.0  ;;  %v695_v6 = vmin.f32 %v679_v62, 0.0  ;;  %v692_v9 = vmin.f32 %v2251_v3, 0.0  ;;  %v694_v15 = vmin.f32 %v2255_v60, 0.0 }
 0x230   :  { %v689_v4 = vmin.f32 %v673_v63, 0.0  ;;  %v690_v56 = vmin.f32 %v674_v1, 0.0  ;;  %v691_v59 = vmin.f32 %v2249_v2, 0.0  ;;  %v693_v12 = vmin.f32 %v2253_v7, 0.0 }
 0x231   :  { %v696_v57 = vmul.f32 1.442695, %v688_v52  ;;  %v710_v58 = vmul.f32 1.442695, %v695_v6  ;;  %v704_v13 = vmul.f32 1.442695, %v692_v9 }
 0x232   :  { %v698_v0 = vmul.f32 1.442695, %v689_v4  ;;  %v700_v8 = vmul.f32 1.442695, %v690_v56  ;;  %v702_v11 = vmul.f32 1.442695, %v691_v59 }
 0x233   :  { %1930 = vpow2.f32 %v696_v57  ;;  %v706_v16 = vmul.f32 1.442695, %v693_v12  ;;  %v708_v18 = vmul.f32 1.442695, %v694_v15  ;;  %vm680_vm9 = vcmp.gt.f32.partialorder %v672_v61, 0.0 }
 0x234   :  { %1932 = vpow2.f32 %v698_v0  ;;  %vm681_vm10 = vcmp.gt.f32.partialorder %v673_v63, 0.0  ;;  %vm687_vm11 = vcmp.gt.f32.partialorder %v679_v62, 0.0  ;;  %vm682_vm12 = vcmp.gt.f32.partialorder %v674_v1, 0.0 }
 0x235   :  { %1934 = vpow2.f32 %v710_v58  ;;  %vm683_vm13 = vcmp.gt.f32.partialorder %v2249_v2, 0.0  ;;  %vm684_vm14 = vcmp.gt.f32.partialorder %v2251_v3, 0.0  ;;  %vm685_vm3 = vcmp.gt.f32.partialorder %v2253_v7, 0.0 }
 0x236   :  { %1936 = vpow2.f32 %v700_v8  ;;  %vm686_vm4 = vcmp.gt.f32.partialorder %v2255_v60, 0.0 }
 0x237   :  { %1938 = vpow2.f32 %v702_v11 }
 0x238   :  { %1940 = vpow2.f32 %v704_v13 }
 0x239   :  { %v1931_v20 = vpop.eup %1930  ;;  %1942 = vpow2.f32 %v706_v16  ;;  %v1834_v16 = vld [vmem:[%s2697_s3 + $0x28] sm:$0xff] }
 0x23a   :  { %v1933_v21 = vpop.eup %1932  ;;  %v1824_v23 = vadd.f32 -1.0, %v1931_v20  ;;  %1944 = vpow2.f32 %v708_v18  ;;  %898 = vmatpush.msrb.mxu2 %v1834_v16  ;;  %v1832_v20 = vld [vmem:[%s2697_s3 + $0x18] sm:$0xff] }
 0x23b   :  { %v1935_v22 = vpop.eup %1934  ;;  %v1825_v24 = vadd.f32 -1.0, %v1933_v21 }
 0x23c   :  { %v1937_v25 = vpop.eup %1936  ;;  %v720_v26 = vsel %vm680_vm9, %v672_v61, %v1824_v23  ;;  %v1831_v28 = vadd.f32 -1.0, %v1935_v22 }
 0x23d   :  { %v1939_v29 = vpop.eup %1938  ;;  %817 = vrot.lane.b32.xlu2 %v720_v26, %s1985_s24  ;;  %v728_v5 = vrot.slane %v720_v26, 4  ;;  %v753_v30 = vrot.slane %v720_v26, 6  ;;  %v721_v31 = vsel %vm681_vm10, %v673_v63, %v1825_v24  ;;  %v1826_v33 = vadd.f32 -1.0, %v1937_v25 }
 0x23e   :  { %v1941_v35 = vpop.eup %1940  ;;  %v754_v36 = vrot.slane %v721_v31, 6  ;;  %v727_v19 = vsel %vm687_vm11, %v679_v62, %v1831_v28  ;;  %v1827_v37 = vadd.f32 -1.0, %v1939_v29  ;;  %v729_v38 = vrot.slane %v721_v31, 4 }
 0x23f   :  { %v1943_v40 = vpop.eup %1942  ;;  %v760_v41 = vrot.slane %v727_v19, 6  ;;  %v722_v42 = vsel %vm682_vm12, %v674_v1, %v1826_v33  ;;  %v1828_v39 = vadd.f32 -1.0, %v1941_v35  ;;  %v735_v43 = vrot.slane %v727_v19, 4 }
 0x240   :  { %v1945_v44 = vpop.eup %1944  ;;  %v767_v45 = vsel %vm393_vm5, %v753_v30, %v754_v36  ;;  %v755_v34 = vrot.slane %v722_v42, 6  ;;  %v723_v46 = vsel %vm683_vm13, %v2249_v2, %v1827_v37  ;;  %v1829_v47 = vadd.f32 -1.0, %v1943_v40 }
 0x241   :  { %787 = vrot.lane.b32.xlu0 %v767_v45, %s1984_s2  ;;  %v768_v48 = vsel %vm393_vm5, %v760_v41, %v753_v30  ;;  %v731_v49 = vrot.slane %v723_v46, 4  ;;  %v756_v50 = vrot.slane %v723_v46, 6  ;;  %v724_v53 = vsel %vm684_vm14, %v2251_v3, %v1828_v39 }
 0x242   :  { %v769_v54 = vmul.f32 %v2189_v51, %v768_v48  ;;  %v766_v55 = vsel %vm393_vm5, %v754_v36, %v755_v34  ;;  %v757_v61 = vrot.slane %v724_v53, 6  ;;  %v725_v62 = vsel %vm685_vm3, %v2253_v7, %v1829_v47 }
 0x243   :  { %v765_v63 = vsel %vm393_vm5, %v755_v34, %v756_v50  ;;  %v758_v1 = vrot.slane %v725_v62, 6  ;;  %v1830_v2 = vadd.f32 -1.0, %v1945_v44  ;;  %v730_v52 = vrot.slane %v722_v42, 4 }
 0x244   :  { %785 = vrot.lane.b32.xlu1 %v769_v54, %s1984_s2  ;;  %v764_v3 = vsel %vm393_vm5, %v756_v50, %v757_v61  ;;  %v732_v51 = vrot.slane %v724_v53, 4  ;;  %v733_v6 = vrot.slane %v725_v62, 4  ;;  %v743_v4 = vsel %vm736_vm8, %v728_v5, %v729_v38 }
 0x245   :  { %789 = vrot.lane.b32.xlu2 %v766_v55, %s1984_s2  ;;  %v763_v7 = vsel %vm393_vm5, %v757_v61, %v758_v1  ;;  %v726_v56 = vsel %vm686_vm4, %v2255_v60, %v1830_v2  ;;  %v742_v57 = vsel %vm736_vm8, %v729_v38, %v730_v52  ;;  %v744_v8 = vsel %vm736_vm8, %v735_v43, %v728_v5 }
 0x246   :  { %v734_v58 = vrot.slane %v726_v56, 4  ;;  %v759_v59 = vrot.slane %v726_v56, 6  ;;  %v739_v0 = vsel %vm736_vm8, %v732_v51, %v733_v6  ;;  %v740_v9 = vsel %vm736_vm8, %v731_v49, %v732_v51 }
 0x247   :  { %v741_v11 = vsel %vm736_vm8, %v730_v52, %v731_v49  ;;  %v773_v18 = vmul.f32 %v2211_v10, %v764_v3  ;;  %v1833_v10 = vld [vmem:[%s2697_s3 + $0x20] sm:$0xff]  ;;  %v2361_v40 = vsel %vm194_vm6, 1.0, %v1986_v27 }
 0x248   :  { %v761_v60 = vsel %vm393_vm5, %v759_v59, %v760_v41  ;;  %v762_v12 = vsel %vm393_vm5, %v758_v1, %v759_v59  ;;  %v2316_v13 = vsel %vm736_vm8, %v734_v58, %v735_v43  ;;  %v738_v15 = vsel %vm736_vm8, %v733_v6, %v734_v58  ;;  %899 = vmatpush.msrb.mxu2 %v1833_v10 }
 0x249   :  { %821 = vrot.lane.b32.xlu0 %v722_v42, %s1985_s24  ;;  %vm190_vm5 = vcmp.ge.s32.totalorder %v2122_v17, 4  ;;  %v749_v42 = vmul.f32 %v2361_v40, %v740_v9 }
 0x24a   :  { %900 = vmatpush.msrb.mxu2 %v1832_v20  ;;  %v2344_v21 = vsel %vm190_vm5, 1.0, %v1986_v27 }
 0x24b   :  { %v745_v23 = vmul.f32 %v2344_v21, %v744_v8 }
 0x24c   :  { %819 = vrot.lane.b32.xlu1 %v721_v31, %s1985_s24 }
 0x24d   :  { %823 = vrot.lane.b32.xlu2 %v723_v46, %s1985_s24 }
 0x251   :  { %793 = vrot.lane.b32.xlu0 %v773_v18, %s1984_s2 }
 0x254   :  { %791 = vrot.lane.b32.xlu1 %v765_v63, %s1984_s2 }
 0x255   :  { %795 = vrot.lane.b32.xlu2 %v763_v7, %s1984_s2 }
 0x259   :  { %827 = vrot.lane.b32.xlu0 %v725_v62, %s1985_s24 }
 0x25c   :  { %825 = vrot.lane.b32.xlu1 %v724_v53, %s1985_s24 }
 0x25d   :  { %829 = vrot.lane.b32.xlu2 %v726_v56, %s1985_s24 }
 0x261   :  { %799 = vrot.lane.b32.xlu0 %v761_v60, %s1984_s2 }
 0x264   :  { %797 = vrot.lane.b32.xlu1 %v762_v12, %s1984_s2 }
 0x26c   :  { %831 = vrot.lane.b32.xlu1 %v727_v19, %s1985_s24 }
 0x297   :  { %v818_v24 = vpop.permute.xlu2 %817 }
 0x29f   :  { %v790_v17 = vpop.permute.xlu2 %789 }
 0x2a0   :  { %v843_v33 = vsel %vm499_vm15, %v742_v57, %v790_v17 }
 0x2a7   :  { %v824_v37 = vpop.permute.xlu2 %823 }
 0x2af   :  { %v796_v45 = vpop.permute.xlu2 %795 }
 0x2b0   :  { %v846_v14 = vsel %vm499_vm15, %v739_v0, %v796_v45 }
 0x2b3   :  { %v788_v28 = vpop.permute.xlu0 %787 }
 0x2b4   :  { %v842_v29 = vsel %vm499_vm15, %v743_v4, %v788_v28 }
 0x2b6   :  { %v786_v22 = vpop.permute.xlu1 %785 }
 0x2b7   :  { %v841_v25 = vsel %vm499_vm15, %v745_v23, %v786_v22  ;;  %v830_v48 = vpop.permute.xlu2 %829 }
 0x2b8   :  { %v849_v26 = vsel %vm508_vm2, %v841_v25, %v818_v24 }
 0x2b9   :  { %1835 = vmatmul.msk.f32.vlgmr.msrb.gmra.mxu2 %vm520_vm0, %v849_v26 }
 0x2bb   :  { %v822_v31 = vpop.permute.xlu0 %821 }
 0x2bc   :  { %v851_v35 = vsel %vm508_vm2, %v843_v33, %v822_v31 }
 0x2be   :  { %v820_v5 = vpop.permute.xlu1 %819 }
 0x2bf   :  { %v850_v30 = vsel %vm508_vm2, %v842_v29, %v820_v5 }
 0x2c1   :  { %1836 = vmatmul.msk.f32.gmra.mxu2 %vm520_vm0, %v850_v30 }
 0x2c3   :  { %v794_v41 = vpop.permute.xlu0 %793 }
 0x2c4   :  { %v845_v43 = vsel %vm499_vm15, %v749_v42, %v794_v41 }
 0x2c6   :  { %v792_v36 = vpop.permute.xlu1 %791 }
 0x2c7   :  { %v844_v19 = vsel %vm499_vm15, %v741_v11, %v792_v36 }
 0x2c8   :  { %v852_v38 = vsel %vm508_vm2, %v844_v19, %v824_v37 }
 0x2c9   :  { %1837 = vmatmul.msk.f32.gmra.mxu2 %vm520_vm0, %v851_v35 }
 0x2cb   :  { %v828_v34 = vpop.permute.xlu0 %827 }
 0x2cc   :  { %v854_v46 = vsel %vm508_vm2, %v846_v14, %v828_v34 }
 0x2ce   :  { %v826_v39 = vpop.permute.xlu1 %825 }
 0x2cf   :  { %v853_v44 = vsel %vm508_vm2, %v845_v43, %v826_v39 }
 0x2d1   :  { %1838 = vmatmul.msk.f32.gmra.mxu2 %vm520_vm0, %v852_v38 }
 0x2d3   :  { %v800_v50 = vpop.permute.xlu0 %799 }
 0x2d4   :  { %v848_v54 = vsel %vm499_vm15, %v2316_v13, %v800_v50 }
 0x2d6   :  { %v798_v27 = vpop.permute.xlu1 %797 }
 0x2d7   :  { %v847_v47 = vsel %vm499_vm15, %v738_v15, %v798_v27 }
 0x2d8   :  { %v855_v49 = vsel %vm508_vm2, %v847_v47, %v830_v48 }
 0x2d9   :  { %1839 = vmatmul.msk.f32.gmra.mxu2 %vm520_vm0, %v853_v44 }
 0x2de   :  { %v832_v53 = vpop.permute.xlu1 %831 }
 0x2df   :  { %v856_v55 = vsel %vm508_vm2, %v848_v54, %v832_v53 }
 0x2e1   :  { %1840 = vmatmul.msk.f32.gmra.mxu2 %vm520_vm0, %v854_v46 }
 0x2e9   :  { %1841 = vmatmul.msk.f32.gmra.mxu2 %vm520_vm0, %v855_v49 }
 0x2f1   :  { %1842 = vmatmul.msk.f32.gmra.mxu2 %vm520_vm0, %v856_v55 }
 0x33c   :  { %v902_v61 = vpop.f32.mrf.mxu2 }
 0x33d   :  { %v926_v51 = vsel %vm499_vm15, %v902_v61, 0.0 }
 0x344   :  { %v905_v62 = vpop.f32.mrf.mxu2 }
 0x345   :  { %v927_v3 = vsel %vm499_vm15, %v905_v62, 0.0 }
 0x346   :  { %v928_v4 = vadd.f32 %v927_v3, %v926_v51 }
 0x34c   :  { %v908_v63 = vpop.f32.mrf.mxu2 }
 0x34d   :  { %v929_v6 = vsel %vm499_vm15, %v908_v63, 0.0 }
 0x34e   :  { %v930_v56 = vadd.f32 %v929_v6, %v928_v4 }
 0x354   :  { %v911_v1 = vpop.f32.mrf.mxu2 }
 0x355   :  { %v931_v7 = vsel %vm499_vm15, %v911_v1, 0.0 }
 0x356   :  { %v932_v59 = vadd.f32 %v931_v7, %v930_v56 }
 0x35c   :  { %v914_v2 = vpop.f32.mrf.mxu2 }
 0x35d   :  { %v933_v58 = vsel %vm499_vm15, %v914_v2, 0.0 }
 0x35e   :  { %v934_v8 = vadd.f32 %v933_v58, %v932_v59  ;;  %v1843_v59 = vld [vmem:[%s2699_s4 + $0x1] sm:$0x1] }
 0x364   :  { %v917_v52 = vpop.f32.mrf.mxu2 }
 0x365   :  { %v935_v0 = vsel %vm499_vm15, %v917_v52, 0.0 }
 0x366   :  { %v936_v11 = vadd.f32 %v935_v0, %v934_v8 }
 0x36c   :  { %v920_v57 = vpop.f32.mrf.mxu2 }
 0x36d   :  { %v937_v9 = vsel %vm499_vm15, %v920_v57, 0.0 }
 0x36e   :  { %v938_v60 = vadd.f32 %v937_v9, %v936_v11  ;;  %v1908_v11 = vld [vmem:[%s2698_s5 + $0x1] ss:$0 sm:$0xff] }
 0x374   :  { %v923_v12 = vpop.f32.mrf.mxu2 }
 0x375   :  { %v939_v13 = vsel %vm499_vm15, %v923_v12, 0.0 }
 0x376   :  { %v940_v15 = vadd.f32 %v939_v13, %v938_v60 }
 0x378   :  { %v941_v16 = vrot.slane %v940_v15, 4 }
 0x37a   :  { %v942_v18 = vadd.f32 %v941_v16, %v940_v15 }
 0x37c   :  { %v943_v10 = vrot.slane %v942_v18, 2 }
 0x37e   :  { %v944_v20 = vadd.f32 %v943_v10, %v942_v18 }
 0x380   :  { %v945_v23 = vrot.slane %v944_v20, 1 }
 0x382   :  { %v946_v22 = vadd.f32 %v945_v23, %v944_v20 }
 0x384   :  { %v947_v24 = vmul.f32 0.015625, %v946_v22 }
 0x386   :  { %v948_v25 = vsub.f32 %v902_v61, %v947_v24  ;;  %v949_v26 = vsub.f32 %v905_v62, %v947_v24  ;;  %v950_v28 = vsub.f32 %v908_v63, %v947_v24  ;;  %v951_v29 = vsub.f32 %v911_v1, %v947_v24 }
 0x387   :  { %v952_v5 = vsub.f32 %v914_v2, %v947_v24  ;;  %v953_v33 = vsub.f32 %v917_v52, %v947_v24  ;;  %v954_v38 = vsub.f32 %v920_v57, %v947_v24  ;;  %v955_v43 = vsub.f32 %v923_v12, %v947_v24 }
 0x388   :  { %v956_v30 = vmul.f32 %v948_v25, %v948_v25  ;;  %v957_v17 = vmul.f32 %v949_v26, %v949_v26  ;;  %v958_v31 = vmul.f32 %v950_v28, %v950_v28  ;;  %v959_v35 = vmul.f32 %v951_v29, %v951_v29 }
 0x389   :  { %v960_v41 = vmul.f32 %v952_v5, %v952_v5  ;;  %v961_v44 = vmul.f32 %v953_v33, %v953_v33  ;;  %v962_v14 = vmul.f32 %v954_v38, %v954_v38  ;;  %v963_v47 = vmul.f32 %v955_v43, %v955_v43 }
 0x38a   :  { %v964_v36 = vsel %vm499_vm15, %v956_v30, 0.0  ;;  %v965_v19 = vsel %vm499_vm15, %v957_v17, 0.0  ;;  %v967_v42 = vsel %vm499_vm15, %v958_v31, 0.0  ;;  %v969_v45 = vsel %vm499_vm15, %v959_v35, 0.0 }
 0x38b   :  { %v966_v37 = vadd.f32 %v965_v19, %v964_v36  ;;  %v971_v46 = vsel %vm499_vm15, %v960_v41, 0.0  ;;  %v973_v48 = vsel %vm499_vm15, %v961_v44, 0.0  ;;  %v975_v50 = vsel %vm499_vm15, %v962_v14, 0.0 }
 0x38c   :  { %v977_v54 = vsel %vm499_vm15, %v963_v47, 0.0 }
 0x38d   :  { %v968_v39 = vadd.f32 %v967_v42, %v966_v37 }
 0x38f   :  { %v970_v34 = vadd.f32 %v969_v45, %v968_v39 }
 0x391   :  { %v972_v27 = vadd.f32 %v971_v46, %v970_v34 }
 0x393   :  { %v974_v49 = vadd.f32 %v973_v48, %v972_v27 }
 0x395   :  { %v976_v53 = vadd.f32 %v975_v50, %v974_v49 }
 0x397   :  { %v978_v55 = vadd.f32 %v977_v54, %v976_v53 }
 0x399   :  { %v979_v61 = vrot.slane %v978_v55, 4 }
 0x39b   :  { %v980_v62 = vadd.f32 %v979_v61, %v978_v55 }
 0x39d   :  { %v981_v63 = vrot.slane %v980_v62, 2 }
 0x39f   :  { %v982_v1 = vadd.f32 %v981_v63, %v980_v62 }
 0x3a1   :  { %v983_v2 = vrot.slane %v982_v1, 1 }
 0x3a3   :  { %v984_v52 = vadd.f32 %v983_v2, %v982_v1 }
 0x3a5   :  { %v985_v3 = vmul.f32 0.015625, %v984_v52 }
 0x3a7   :  { %v986_v51 = vadd.f32 1e-05, %v985_v3 }
 0x3a9   :  { %1946 = vrsqrt.f32 %v986_v51  ;;  %vm993_vm9 = vweird.f32 %v986_v51 }
 0x3af   :  { %v1947_v6 = vpop.eup %1946 }
 0x3b0   :  { %v988_v4 = vmul.f32 %v1947_v6, %v986_v51  ;;  %vm994_vm7 = vweird.f32 %v1947_v6 }
 0x3b1   :  { %vm995_vm10 = vmor %vm993_vm9, %vm994_vm7 }
 0x3b2   :  { %v989_v7 = vmul.f32 %v1947_v6, %v988_v4 }
 0x3b4   :  { %v990_v56 = vmul.f32 0.5, %v989_v7 }
 0x3b6   :  { %v991_v57 = vsub.f32 1.5, %v990_v56 }
 0x3b8   :  { %v992_v58 = vmul.f32 %v1947_v6, %v991_v57 }
 0x3ba   :  { %v996_v0 = vsel %vm995_vm10, %v1947_v6, %v992_v58 }
 0x3bb   :  { %v999_v8 = vmul.f32 %v1843_v59, %v996_v0 }
 0x3bd   :  { %v1000_v9 = vperm.slane %v999_v8, 0 }
 0x3bf   :  { %v1008_v60 = vmul.f32 %v1000_v9, %v955_v43  ;;  %v1001_v12 = vmul.f32 %v1000_v9, %v948_v25  ;;  %v1002_v13 = vmul.f32 %v1000_v9, %v949_v26  ;;  %v1003_v15 = vmul.f32 %v1000_v9, %v950_v28 }
 0x3c0   :  { %v1004_v16 = vmul.f32 %v1000_v9, %v951_v29  ;;  %v1005_v18 = vmul.f32 %v1000_v9, %v952_v5  ;;  %v1006_v10 = vmul.f32 %v1000_v9, %v953_v33  ;;  %v1007_v20 = vmul.f32 %v1000_v9, %v954_v38 }
 0x3c1   :  { %v1021_v23 = vadd.f32 %v1908_v11, %v1008_v60  ;;  %v1014_v22 = vadd.f32 %v1908_v11, %v1001_v12  ;;  %v1015_v24 = vadd.f32 %v1908_v11, %v1002_v13  ;;  %v1016_v30 = vadd.f32 %v1908_v11, %v1003_v15 }
 0x3c2   :  { %v1017_v17 = vadd.f32 %v1908_v11, %v1004_v16  ;;  %v1018_v31 = vadd.f32 %v1908_v11, %v1005_v18  ;;  %v1019_v33 = vadd.f32 %v1908_v11, %v1006_v10  ;;  %v1020_v52 = vadd.f32 %v1908_v11, %v1007_v20 }
 0x3c3   :  { %v1037_v35 = vmin.f32 %v1021_v23, 0.0  ;;  %v1030_v36 = vmin.f32 %v1014_v22, 0.0  ;;  %v1031_v19 = vmin.f32 %v1015_v24, 0.0  ;;  %v1032_v37 = vmin.f32 %v1016_v30, 0.0 }
 0x3c4   :  { %v1033_v39 = vmin.f32 %v1017_v17, 0.0  ;;  %v1034_v28 = vmin.f32 %v1018_v31, 0.0  ;;  %v1035_v43 = vmin.f32 %v1019_v33, 0.0  ;;  %vm1029_vm11 = vcmp.gt.f32.partialorder %v1021_v23, 0.0 }
 0x3c5   :  { %v1052_v41 = vmul.f32 1.442695, %v1037_v35  ;;  %v1038_v42 = vmul.f32 1.442695, %v1030_v36  ;;  %v1040_v25 = vmul.f32 1.442695, %v1031_v19 }
 0x3c6   :  { %v1042_v26 = vmul.f32 1.442695, %v1032_v37  ;;  %v1044_v29 = vmul.f32 1.442695, %v1033_v39  ;;  %v1046_v5 = vmul.f32 1.442695, %v1034_v28 }
 0x3c7   :  { %1948 = vpow2.f32 %v1052_v41  ;;  %vm1022_vm12 = vcmp.gt.f32.partialorder %v1014_v22, 0.0  ;;  %vm1023_vm13 = vcmp.gt.f32.partialorder %v1015_v24, 0.0  ;;  %v1048_v53 = vmul.f32 1.442695, %v1035_v43 }
 0x3c8   :  { %1950 = vpow2.f32 %v1038_v42  ;;  %vm1024_vm14 = vcmp.gt.f32.partialorder %v1016_v30, 0.0  ;;  %vm1025_vm3 = vcmp.gt.f32.partialorder %v1017_v17, 0.0  ;;  %vm1026_vm4 = vcmp.gt.f32.partialorder %v1018_v31, 0.0 }
 0x3c9   :  { %1952 = vpow2.f32 %v1040_v25  ;;  %v1036_v57 = vmin.f32 %v1020_v52, 0.0  ;;  %vm1027_vm5 = vcmp.gt.f32.partialorder %v1019_v33, 0.0  ;;  %vm1028_vm6 = vcmp.gt.f32.partialorder %v1020_v52, 0.0 }
 0x3ca   :  { %1954 = vpow2.f32 %v1042_v26 }
 0x3cb   :  { %1956 = vpow2.f32 %v1044_v29  ;;  %v1050_v9 = vmul.f32 1.442695, %v1036_v57 }
 0x3cc   :  { %1958 = vpow2.f32 %v1046_v5 }
 0x3cd   :  { %v1949_v38 = vpop.eup %1948  ;;  %1960 = vpow2.f32 %v1048_v53 }
 0x3ce   :  { %v1951_v44 = vpop.eup %1950  ;;  %v1852_v45 = vadd.f32 -1.0, %v1949_v38  ;;  %1962 = vpow2.f32 %v1050_v9 }
 0x3cf   :  { %v1953_v34 = vpop.eup %1952  ;;  %v1845_v14 = vadd.f32 -1.0, %v1951_v44 }
 0x3d0   :  { %v1955_v46 = vpop.eup %1954  ;;  %v2399_v27 = vsel %vm1029_vm11, %v1021_v23, %v1852_v45  ;;  %v1846_v47 = vadd.f32 -1.0, %v1953_v34 }
 0x3d1   :  { %v2401_v48 = vsel %vm1022_vm12, %v1014_v22, %v1845_v14  ;;  %v1085_v49 = vrot.slane %v2399_v27, 4  ;;  %v1847_v50 = vadd.f32 -1.0, %v1955_v46  ;;  %v1957_v54 = vpop.eup %1956  ;;  %v1070_v36 = vmul.f32 0.0, %v2399_v27 }
 0x3d2   :  { %1142 = vrot.lane.b32.xlu0 %v2401_v48, %s1985_s24  ;;  %v1078_v55 = vrot.slane %v2401_v48, 4  ;;  %v2407_v61 = vsel %vm1023_vm13, %v1015_v24, %v1846_v47  ;;  %v1959_v62 = vpop.eup %1958  ;;  %v1848_v4 = vadd.f32 -1.0, %v1957_v54 }
 0x3d3   :  { %v1079_v63 = vrot.slane %v2407_v61, 4  ;;  %v2410_v1 = vsel %vm1024_vm14, %v1016_v30, %v1847_v50  ;;  %v1849_v7 = vadd.f32 -1.0, %v1959_v62  ;;  %v1855_v30 = vld [vmem:[%s2697_s3 + $0x40] sm:$0xff] }
 0x3d4   :  { %v1093_v2 = vsel %vm736_vm8, %v1085_v49, %v1078_v55  ;;  %v1080_v6 = vrot.slane %v2410_v1, 4  ;;  %v1065_v58 = vsel %vm1025_vm3, %v1017_v17, %v1848_v4  ;;  %v1854_v17 = vld [vmem:[%s2697_s3 + $0x38] sm:$0xff]  ;;  %1223 = vmatpush.msrb.mxu3 %v1855_v30 }
 0x3d5   :  { %v1092_v3 = vsel %vm736_vm8, %v1078_v55, %v1079_v63  ;;  %v1094_v51 = vmul.f32 %v2344_v21, %v1093_v2  ;;  %v2423_v59 = vsel %vm1026_vm4, %v1018_v31, %v1849_v7  ;;  %v1961_v21 = vpop.eup %1960  ;;  %v1081_v0 = vrot.slane %v1065_v58, 4  ;;  %v1853_v31 = vld [vmem:[%s2697_s3 + $0x30] sm:$0xff] }
 0x3d6   :  { %1112 = vrot.lane.b32.xlu1 %v1092_v3, %s1984_s2  ;;  %v1091_v56 = vsel %vm736_vm8, %v1079_v63, %v1080_v6  ;;  %v1082_v8 = vrot.slane %v2423_v59, 4  ;;  %v1850_v11 = vadd.f32 -1.0, %v1961_v21  ;;  %v1963_v18 = vpop.eup %1962  ;;  %1224 = vmatpush.msrb.mxu3 %v1854_v17  ;;  %v1074_v14 = vmul.f32 0.0, %v1065_v58 }
 0x3d7   :  { %1110 = vrot.lane.b32.xlu2 %v1094_v51, %s1984_s2  ;;  %v1090_v16 = vsel %vm736_vm8, %v1080_v6, %v1081_v0  ;;  %v1851_v20 = vadd.f32 -1.0, %v1963_v18 }
 0x3d8   :  { %v1089_v60 = vsel %vm736_vm8, %v1081_v0, %v1082_v8  ;;  %v1067_v12 = vsel %vm1027_vm5, %v1019_v33, %v1850_v11  ;;  %1225 = vmatpush.msrb.mxu3 %v1853_v31 }
 0x3d9   :  { %v1098_v13 = vmul.f32 %v2361_v40, %v1089_v60  ;;  %v1083_v15 = vrot.slane %v1067_v12, 4  ;;  %v1068_v23 = vsel %vm1028_vm6, %v1020_v52, %v1851_v20  ;;  %vm1664_vm6 = vcmp.lt.s32.totalorder %v2078_v32, 7  ;;  %v1911_v32 = vld [vmem:[%s2701_s7] ss:$0 sm:$0xff] }
 0x3da   :  { %1114 = vrot.lane.b32.xlu0 %v1091_v56, %s1984_s2  ;;  %v1084_v40 = vrot.slane %v1068_v23, 4 }
 0x3db   :  { %v1088_v10 = vsel %vm736_vm8, %v1082_v8, %v1083_v15 }
 0x3dc   :  { %v1086_v22 = vsel %vm736_vm8, %v1084_v40, %v1085_v49  ;;  %v1087_v24 = vsel %vm736_vm8, %v1083_v15, %v1084_v40 }
 0x3de   :  { %1146 = vrot.lane.b32.xlu1 %v2410_v1, %s1985_s24 }
 0x3df   :  { %1144 = vrot.lane.b32.xlu2 %v2407_v61, %s1985_s24 }
 0x3e2   :  { %1148 = vrot.lane.b32.xlu0 %v1065_v58, %s1985_s24 }
 0x3e6   :  { %1118 = vrot.lane.b32.xlu1 %v1098_v13, %s1984_s2 }
 0x3e7   :  { %1116 = vrot.lane.b32.xlu2 %v1090_v16, %s1984_s2 }
 0x3ea   :  { %1120 = vrot.lane.b32.xlu0 %v1088_v10, %s1984_s2 }
 0x3ee   :  { %1152 = vrot.lane.b32.xlu1 %v1067_v12, %s1985_s24 }
 0x3ef   :  { %1150 = vrot.lane.b32.xlu2 %v2423_v59, %s1985_s24 }
 0x3f2   :  { %1154 = vrot.lane.b32.xlu0 %v1068_v23, %s1985_s24 }
 0x3f6   :  { %1124 = vrot.lane.b32.xlu1 %v1086_v22, %s1984_s2 }
 0x3f7   :  { %1122 = vrot.lane.b32.xlu2 %v1087_v24, %s1984_s2 }
 0x3ff   :  { %1156 = vrot.lane.b32.xlu2 %v2399_v27, %s1985_s24 }
 0x431   :  { %v1111_v35 = vpop.permute.xlu2 %1110 }
 0x432   :  { %v1166_v19 = vsel %vm499_vm15, %v1070_v36, %v1111_v35 }
 0x439   :  { %v1145_v25 = vpop.permute.xlu2 %1144 }
 0x441   :  { %v1117_v38 = vpop.permute.xlu2 %1116 }
 0x442   :  { %v1169_v44 = vsel %vm499_vm15, %v2410_v1, %v1117_v38 }
 0x444   :  { %v1143_v37 = vpop.permute.xlu0 %1142 }
 0x445   :  { %v1174_v41 = vsel %vm508_vm2, %v1166_v19, %v1143_v37 }
 0x446   :  { %1856 = vmatmul.msk.f32.vlgmr.msrb.gmra.mxu3 %vm520_vm0, %v1174_v41 }
 0x448   :  { %v1113_v42 = vpop.permute.xlu1 %1112 }
 0x449   :  { %v1167_v39 = vsel %vm499_vm15, %v2401_v48, %v1113_v42  ;;  %v1151_v27 = vpop.permute.xlu2 %1150 }
 0x44a   :  { %v1175_v26 = vsel %vm508_vm2, %v1167_v39, %v1145_v25 }
 0x44c   :  { %v1115_v28 = vpop.permute.xlu0 %1114 }
 0x44d   :  { %v1168_v5 = vsel %vm499_vm15, %v2407_v61, %v1115_v28 }
 0x44e   :  { %1857 = vmatmul.msk.f32.gmra.mxu3 %vm520_vm0, %v1175_v26 }
 0x450   :  { %v1147_v29 = vpop.permute.xlu1 %1146 }
 0x451   :  { %v1176_v33 = vsel %vm508_vm2, %v1168_v5, %v1147_v29  ;;  %v1123_v54 = vpop.permute.xlu2 %1122 }
 0x452   :  { %v1172_v61 = vsel %vm499_vm15, %v1067_v12, %v1123_v54 }
 0x454   :  { %v1149_v43 = vpop.permute.xlu0 %1148 }
 0x455   :  { %v1177_v45 = vsel %vm508_vm2, %v1169_v44, %v1149_v43 }
 0x456   :  { %1858 = vmatmul.msk.f32.gmra.mxu3 %vm520_vm0, %v1176_v33 }
 0x458   :  { %v1119_v34 = vpop.permute.xlu1 %1118 }
 0x459   :  { %v1170_v46 = vsel %vm499_vm15, %v1074_v14, %v1119_v34  ;;  %v1157_v2 = vpop.permute.xlu2 %1156 }
 0x45a   :  { %v1178_v47 = vsel %vm508_vm2, %v1170_v46, %v1151_v27 }
 0x45c   :  { %v1121_v48 = vpop.permute.xlu0 %1120 }
 0x45d   :  { %v1171_v50 = vsel %vm499_vm15, %v2423_v59, %v1121_v48 }
 0x45e   :  { %1859 = vmatmul.msk.f32.gmra.mxu3 %vm520_vm0, %v1177_v45 }
 0x460   :  { %v1153_v49 = vpop.permute.xlu1 %1152 }
 0x461   :  { %v1179_v53 = vsel %vm508_vm2, %v1171_v50, %v1153_v49 }
 0x464   :  { %v1155_v55 = vpop.permute.xlu0 %1154 }
 0x465   :  { %v1180_v62 = vsel %vm508_vm2, %v1172_v61, %v1155_v55 }
 0x466   :  { %1860 = vmatmul.msk.f32.gmra.mxu3 %vm520_vm0, %v1178_v47 }
 0x468   :  { %v1125_v63 = vpop.permute.xlu1 %1124 }
 0x469   :  { %v1173_v1 = vsel %vm499_vm15, %v1068_v23, %v1125_v63 }
 0x46a   :  { %v1181_v52 = vsel %vm508_vm2, %v1173_v1, %v1157_v2 }
 0x46e   :  { %1861 = vmatmul.msk.f32.gmra.mxu3 %vm520_vm0, %v1179_v53 }
 0x476   :  { %1862 = vmatmul.msk.f32.gmra.mxu3 %vm520_vm0, %v1180_v62 }
 0x47e   :  { %1863 = vmatmul.msk.f32.gmra.mxu3 %vm520_vm0, %v1181_v52 }
 0x4c9   :  { %v1227_v3 = vpop.f32.mrf.mxu3 }
 0x4ca   :  { %v1251_v58 = vsel %vm499_vm15, %v1227_v3, 0.0 }
 0x4d1   :  { %v1230_v51 = vpop.f32.mrf.mxu3 }
 0x4d2   :  { %v1252_v57 = vsel %vm499_vm15, %v1230_v51, 0.0 }
 0x4d3   :  { %v1253_v21 = vadd.f32 %v1252_v57, %v1251_v58 }
 0x4d9   :  { %v1233_v6 = vpop.f32.mrf.mxu3 }
 0x4da   :  { %v1254_v59 = vsel %vm499_vm15, %v1233_v6, 0.0 }
 0x4db   :  { %v1255_v8 = vadd.f32 %v1254_v59, %v1253_v21 }
 0x4e1   :  { %v1236_v4 = vpop.f32.mrf.mxu3 }
 0x4e2   :  { %v1256_v0 = vsel %vm499_vm15, %v1236_v4, 0.0 }
 0x4e3   :  { %v1257_v60 = vadd.f32 %v1256_v0, %v1255_v8 }
 0x4e9   :  { %v1239_v7 = vpop.f32.mrf.mxu3 }
 0x4ea   :  { %v1258_v11 = vsel %vm499_vm15, %v1239_v7, 0.0 }
 0x4eb   :  { %v1259_v13 = vadd.f32 %v1258_v11, %v1257_v60 }
 0x4f1   :  { %v1242_v56 = vpop.f32.mrf.mxu3 }
 0x4f2   :  { %v1260_v12 = vsel %vm499_vm15, %v1242_v56, 0.0 }
 0x4f3   :  { %v1261_v16 = vadd.f32 %v1260_v12, %v1259_v13  ;;  %v1909_v13 = vld [vmem:[%s2698_s5 + $0x2] ss:$0 sm:$0xff] }
 0x4f9   :  { %v1245_v9 = vpop.f32.mrf.mxu3 }
 0x4fa   :  { %v1262_v15 = vsel %vm499_vm15, %v1245_v9, 0.0 }
 0x4fb   :  { %v1263_v18 = vadd.f32 %v1262_v15, %v1261_v16 }
 0x501   :  { %v1248_v10 = vpop.f32.mrf.mxu3 }
 0x502   :  { %v1264_v20 = vsel %vm499_vm15, %v1248_v10, 0.0 }
 0x503   :  { %v1265_v23 = vadd.f32 %v1264_v20, %v1263_v18 }
 0x505   :  { %v1266_v40 = vrot.slane %v1265_v23, 4 }
 0x507   :  { %v1267_v22 = vadd.f32 %v1266_v40, %v1265_v23 }
 0x509   :  { %v1268_v24 = vrot.slane %v1267_v22, 2 }
 0x50b   :  { %v1269_v30 = vadd.f32 %v1268_v24, %v1267_v22 }
 0x50d   :  { %v1270_v17 = vrot.slane %v1269_v30, 1 }
 0x50f   :  { %v1271_v31 = vadd.f32 %v1270_v17, %v1269_v30 }
 0x511   :  { %v1272_v35 = vmul.f32 0.015625, %v1271_v31 }
 0x513   :  { %v1273_v36 = vsub.f32 %v1227_v3, %v1272_v35  ;;  %v1274_v19 = vsub.f32 %v1230_v51, %v1272_v35  ;;  %v1275_v37 = vsub.f32 %v1233_v6, %v1272_v35  ;;  %v1276_v41 = vsub.f32 %v1236_v4, %v1272_v35 }
 0x514   :  { %v1277_v42 = vsub.f32 %v1239_v7, %v1272_v35  ;;  %v1278_v28 = vsub.f32 %v1242_v56, %v1272_v35  ;;  %v1279_v43 = vsub.f32 %v1245_v9, %v1272_v35  ;;  %v1280_v14 = vsub.f32 %v1248_v10, %v1272_v35  ;;  %v1864_v9 = vld [vmem:[%s2699_s4 + $0x2] sm:$0x1] }
 0x515   :  { %v1281_v39 = vmul.f32 %v1273_v36, %v1273_v36  ;;  %v1282_v25 = vmul.f32 %v1274_v19, %v1274_v19  ;;  %v1283_v26 = vmul.f32 %v1275_v37, %v1275_v37  ;;  %v1284_v29 = vmul.f32 %v1276_v41, %v1276_v41 }
 0x516   :  { %v1285_v44 = vmul.f32 %v1277_v42, %v1277_v42  ;;  %v1286_v46 = vmul.f32 %v1278_v28, %v1278_v28  ;;  %v1287_v48 = vmul.f32 %v1279_v43, %v1279_v43  ;;  %v1288_v53 = vmul.f32 %v1280_v14, %v1280_v14 }
 0x517   :  { %v1289_v5 = vsel %vm499_vm15, %v1281_v39, 0.0  ;;  %v1290_v33 = vsel %vm499_vm15, %v1282_v25, 0.0  ;;  %v1292_v45 = vsel %vm499_vm15, %v1283_v26, 0.0  ;;  %v1294_v27 = vsel %vm499_vm15, %v1284_v29, 0.0 }
 0x518   :  { %v1291_v38 = vadd.f32 %v1290_v33, %v1289_v5  ;;  %v1296_v49 = vsel %vm499_vm15, %v1285_v44, 0.0  ;;  %v1298_v54 = vsel %vm499_vm15, %v1286_v46, 0.0  ;;  %v1300_v61 = vsel %vm499_vm15, %v1287_v48, 0.0 }
 0x519   :  { %v1302_v63 = vsel %vm499_vm15, %v1288_v53, 0.0 }
 0x51a   :  { %v1293_v34 = vadd.f32 %v1292_v45, %v1291_v38 }
 0x51c   :  { %v1295_v47 = vadd.f32 %v1294_v27, %v1293_v34 }
 0x51e   :  { %v1297_v50 = vadd.f32 %v1296_v49, %v1295_v47 }
 0x520   :  { %v1299_v55 = vadd.f32 %v1298_v54, %v1297_v50 }
 0x522   :  { %v1301_v62 = vadd.f32 %v1300_v61, %v1299_v55 }
 0x524   :  { %v1303_v1 = vadd.f32 %v1302_v63, %v1301_v62 }
 0x526   :  { %v1304_v2 = vrot.slane %v1303_v1, 4 }
 0x528   :  { %v1305_v52 = vadd.f32 %v1304_v2, %v1303_v1 }
 0x52a   :  { %v1306_v3 = vrot.slane %v1305_v52, 2 }
 0x52c   :  { %v1307_v51 = vadd.f32 %v1306_v3, %v1305_v52  ;;  %v1876_v52 = vld [vmem:[%s2697_s3 + $0x58] sm:$0xff] }
 0x52d   :  { %1532 = vmatpush.msrb.mxu0 %v1876_v52 }
 0x52e   :  { %v1308_v6 = vrot.slane %v1307_v51, 1 }
 0x530   :  { %v1309_v4 = vadd.f32 %v1308_v6, %v1307_v51 }
 0x532   :  { %v1310_v7 = vmul.f32 0.015625, %v1309_v4 }
 0x534   :  { %v1311_v56 = vadd.f32 1e-05, %v1310_v7 }
 0x536   :  { %1964 = vrsqrt.f32 %v1311_v56  ;;  %vm1318_vm7 = vweird.f32 %v1311_v56 }
 0x53c   :  { %v1965_v57 = vpop.eup %1964 }
 0x53d   :  { %v1313_v58 = vmul.f32 %v1965_v57, %v1311_v56  ;;  %vm1319_vm8 = vweird.f32 %v1965_v57 }
 0x53e   :  { %vm1320_vm9 = vmor %vm1318_vm7, %vm1319_vm8 }
 0x53f   :  { %v1314_v59 = vmul.f32 %v1965_v57, %v1313_v58 }
 0x541   :  { %v1315_v21 = vmul.f32 0.5, %v1314_v59 }
 0x543   :  { %v1316_v0 = vsub.f32 1.5, %v1315_v21 }
 0x545   :  { %v1317_v8 = vmul.f32 %v1965_v57, %v1316_v0 }
 0x547   :  { %v1321_v11 = vsel %vm1320_vm9, %v1965_v57, %v1317_v8 }
 0x548   :  { %v1324_v60 = vmul.f32 %v1864_v9, %v1321_v11  ;;  %v1875_v11 = vld [vmem:[%s2697_s3 + $0x50] sm:$0xff] }
 0x549   :  { %1533 = vmatpush.msrb.mxu0 %v1875_v11 }
 0x54a   :  { %v1325_v12 = vperm.slane %v1324_v60, 0  ;;  %v1874_v60 = vld [vmem:[%s2697_s3 + $0x48] sm:$0xff] }
 0x54b   :  { %1534 = vmatpush.msrb.mxu0 %v1874_v60 }
 0x54c   :  { %v1333_v15 = vmul.f32 %v1325_v12, %v1280_v14  ;;  %v1326_v16 = vmul.f32 %v1325_v12, %v1273_v36  ;;  %v1328_v18 = vmul.f32 %v1325_v12, %v1275_v37  ;;  %v1327_v10 = vmul.f32 %v1325_v12, %v1274_v19 }
 0x54d   :  { %v1329_v20 = vmul.f32 %v1325_v12, %v1276_v41  ;;  %v1331_v23 = vmul.f32 %v1325_v12, %v1278_v28  ;;  %v1330_v40 = vmul.f32 %v1325_v12, %v1277_v42  ;;  %v1332_v22 = vmul.f32 %v1325_v12, %v1279_v43  ;;  %v1890_v12 = vld [vmem:[%s2695_s0 + $0x1] ss:$2 sm:$0xff] }
 0x54e   :  { %v1346_v24 = vadd.f32 %v1909_v13, %v1333_v15  ;;  %v1339_v30 = vadd.f32 %v1909_v13, %v1326_v16  ;;  %v1341_v17 = vadd.f32 %v1909_v13, %v1328_v18  ;;  %v1340_v31 = vadd.f32 %v1909_v13, %v1327_v10 }
 0x54f   :  { %v1342_v29 = vadd.f32 %v1909_v13, %v1329_v20  ;;  %v1344_v44 = vadd.f32 %v1909_v13, %v1331_v23  ;;  %v1343_v34 = vadd.f32 %v1909_v13, %v1330_v40  ;;  %v1345_v62 = vadd.f32 %v1909_v13, %v1332_v22  ;;  %v1892_v13 = vld [vmem:[%s2695_s0 + $0x21] ss:$2 sm:$0xff]  ;;  %v1893_v20 = vld [vmem:[%s2695_s0 + $0x31] ss:$2 sm:$0xff] }
 0x550   :  { %v1362_v35 = vmin.f32 %v1346_v24, 0.0  ;;  %v1355_v39 = vmin.f32 %v1339_v30, 0.0  ;;  %v1357_v25 = vmin.f32 %v1341_v17, 0.0  ;;  %v1356_v26 = vmin.f32 %v1340_v31, 0.0 }
 0x551   :  { %v1358_v19 = vmin.f32 %v1342_v29, 0.0  ;;  %vm1354_vm10 = vcmp.gt.f32.partialorder %v1346_v24, 0.0  ;;  %vm1347_vm11 = vcmp.gt.f32.partialorder %v1339_v30, 0.0  ;;  %v1360_v48 = vmin.f32 %v1344_v44, 0.0 }
 0x552   :  { %v1377_v5 = vmul.f32 1.442695, %v1362_v35  ;;  %v1363_v33 = vmul.f32 1.442695, %v1355_v39  ;;  %v1367_v38 = vmul.f32 1.442695, %v1357_v25 }
 0x553   :  { %v1365_v36 = vmul.f32 1.442695, %v1356_v26  ;;  %v1369_v37 = vmul.f32 1.442695, %v1358_v19  ;;  %v1359_v49 = vmin.f32 %v1343_v34, 0.0  ;;  %vm1349_vm12 = vcmp.gt.f32.partialorder %v1341_v17, 0.0 }
 0x554   :  { %1966 = vpow2.f32 %v1377_v5  ;;  %v1373_v55 = vmul.f32 1.442695, %v1360_v48  ;;  %vm1348_vm13 = vcmp.gt.f32.partialorder %v1340_v31, 0.0  ;;  %vm1350_vm14 = vcmp.gt.f32.partialorder %v1342_v29, 0.0 }
 0x555   :  { %1968 = vpow2.f32 %v1363_v33  ;;  %v1371_v61 = vmul.f32 1.442695, %v1359_v49  ;;  %v1361_v3 = vmin.f32 %v1345_v62, 0.0  ;;  %vm1352_vm3 = vcmp.gt.f32.partialorder %v1344_v44, 0.0 }
 0x556   :  { %1970 = vpow2.f32 %v1367_v38  ;;  %vm1351_vm4 = vcmp.gt.f32.partialorder %v1343_v34, 0.0  ;;  %vm1353_vm5 = vcmp.gt.f32.partialorder %v1345_v62, 0.0  ;;  %v1735_v38 = vld [vmem:[%s2700_s6] sm:$0xff] }
 0x557   :  { %1972 = vpow2.f32 %v1365_v36  ;;  %v1375_v4 = vmul.f32 1.442695, %v1361_v3  ;;  %1767 = vmatpush.msrb.mxu1 %v1735_v38  ;;  %v1889_v3 = vld [vmem:[%s2695_s0 + $0x30] ss:$2 sm:$0xff] }
 0x558   :  { %1974 = vpow2.f32 %v1369_v37 }
 0x559   :  { %1976 = vpow2.f32 %v1373_v55 }
 0x55a   :  { %v1967_v41 = vpop.eup %1966  ;;  %1978 = vpow2.f32 %v1371_v61  ;;  %v1887_v61 = vld [vmem:[%s2695_s0 + $0x10] ss:$2 sm:$0xff] }
 0x55b   :  { %v1969_v42 = vpop.eup %1968  ;;  %v1873_v28 = vadd.f32 -1.0, %v1967_v41  ;;  %1980 = vpow2.f32 %v1375_v4 }
 0x55c   :  { %v1866_v43 = vadd.f32 -1.0, %v1969_v42  ;;  %v1971_v14 = vpop.eup %1970 }
 0x55d   :  { %v1394_v45 = vsel %vm1354_vm10, %v1346_v24, %v1873_v28  ;;  %v1973_v47 = vpop.eup %1972  ;;  %v1868_v50 = vadd.f32 -1.0, %v1971_v14 }
 0x55e   :  { %v2513_v46 = vsel %vm1347_vm11, %v1339_v30, %v1866_v43  ;;  %v2515_v27 = vmul.f32 0.0, %v1394_v45  ;;  %v1867_v53 = vadd.f32 -1.0, %v1973_v47  ;;  %v1975_v54 = vpop.eup %1974  ;;  %v1891_v30 = vld [vmem:[%s2695_s0 + $0x11] ss:$2 sm:$0xff] }
 0x55f   :  { %1421 = vrot.lane.b32.xlu2 %v2513_v46, %s1984_s2  ;;  %1451 = vrot.lane.b32.xlu1 %v2513_v46, %s1985_s24  ;;  %v2523_v63 = vsel %vm1349_vm12, %v1341_v17, %v1868_v50  ;;  %v1869_v2 = vadd.f32 -1.0, %v1975_v54  ;;  %v1977_v7 = vpop.eup %1976 }
 0x560   :  { %1419 = vrot.lane.b32.xlu0 %v2515_v27, %s1984_s2  ;;  %v2525_v1 = vsel %vm1348_vm13, %v1340_v31, %v1867_v53  ;;  %v1979_v56 = vpop.eup %1978  ;;  %v1871_v57 = vadd.f32 -1.0, %v1977_v7  ;;  %v1399_v19 = vmul.f32 0.0, %v2523_v63  ;;  %v1700_v53 = vld [vmem:[%s2695_s0] ss:$2 sm:$0xff] }
 0x561   :  { %v1390_v51 = vsel %vm1350_vm14, %v1342_v29, %v1869_v2  ;;  %v1870_v58 = vadd.f32 -1.0, %v1979_v56  ;;  %v1981_v0 = vpop.eup %1980 }
 0x562   :  { %v2536_v6 = vmul.f32 0.0, %v1390_v51  ;;  %v2543_v59 = vsel %vm1352_vm3, %v1344_v44, %v1871_v57  ;;  %v1872_v8 = vadd.f32 -1.0, %v1981_v0 }
 0x563   :  { %v1391_v21 = vsel %vm1351_vm4, %v1343_v34, %v1870_v58 }
 0x564   :  { %v1393_v9 = vsel %vm1353_vm5, %v1345_v62, %v1872_v8 }
 0x565   :  { %v1395_v15 = vmul.f32 0.0, %v1393_v9 }
 0x567   :  { %1455 = vrot.lane.b32.xlu2 %v2523_v63, %s1985_s24  ;;  %1423 = vrot.lane.b32.xlu1 %v2525_v1, %s1984_s2 }
 0x568   :  { %1453 = vrot.lane.b32.xlu0 %v2525_v1, %s1985_s24 }
 0x56f   :  { %1427 = vrot.lane.b32.xlu2 %v2536_v6, %s1984_s2  ;;  %1457 = vrot.lane.b32.xlu1 %v1390_v51, %s1985_s24 }
 0x570   :  { %1425 = vrot.lane.b32.xlu0 %v2523_v63, %s1984_s2 }
 0x577   :  { %1461 = vrot.lane.b32.xlu2 %v2543_v59, %s1985_s24  ;;  %1429 = vrot.lane.b32.xlu1 %v1391_v21, %s1984_s2 }
 0x578   :  { %1459 = vrot.lane.b32.xlu0 %v1391_v21, %s1985_s24 }
 0x57f   :  { %1433 = vrot.lane.b32.xlu2 %v1393_v9, %s1984_s2  ;;  %1463 = vrot.lane.b32.xlu1 %v1393_v9, %s1985_s24 }
 0x580   :  { %1431 = vrot.lane.b32.xlu0 %v2543_v59, %s1984_s2 }
 0x587   :  { %1719 = vrot.lane.b32.xlu1 %v1890_v12, %s1987_s18  ;;  %1721 = vrot.lane.b32.xlu2 %v1891_v30, %s1987_s18 }
 0x588   :  { %1465 = vrot.lane.b32.xlu0 %v1394_v45, %s1985_s24 }
 0x58f   :  { %1725 = vrot.lane.b32.xlu1 %v1893_v20, %s1987_s18 }
 0x590   :  { %1723 = vrot.lane.b32.xlu0 %v1892_v13, %s1987_s18 }
 0x5b9   :  { %v1422_v40 = vpop.permute.xlu2 %1421 }
 0x5ba   :  { %v1476_v22 = vsel %vm499_vm15, %v2515_v27, %v1422_v40 }
 0x5c1   :  { %v1456_v39 = vpop.permute.xlu2 %1455 }
 0x5c9   :  { %v1428_v36 = vpop.permute.xlu2 %1427 }
 0x5ca   :  { %v1479_v41 = vsel %vm499_vm15, %v1399_v19, %v1428_v36 }
 0x5d1   :  { %v1452_v18 = vpop.permute.xlu1 %1451  ;;  %v1462_v44 = vpop.permute.xlu2 %1461 }
 0x5d2   :  { %v1420_v16 = vpop.permute.xlu0 %1419 }
 0x5d3   :  { %v1475_v10 = vsel %vm499_vm15, %v1395_v15, %v1420_v16 }
 0x5d4   :  { %v1483_v23 = vsel %vm508_vm2, %v1475_v10, %v1452_v18 }
 0x5d5   :  { %1877 = vmatmul.msk.f32.vlgmr.msrb.gmra.mxu0 %vm520_vm0, %v1483_v23 }
 0x5d9   :  { %v1424_v31 = vpop.permute.xlu1 %1423  ;;  %v1434_v47 = vpop.permute.xlu2 %1433 }
 0x5da   :  { %v1454_v24 = vpop.permute.xlu0 %1453  ;;  %v1477_v35 = vsel %vm499_vm15, %v2513_v46, %v1424_v31  ;;  %v1482_v49 = vsel %vm499_vm15, %v2543_v59, %v1434_v47 }
 0x5db   :  { %v1484_v17 = vsel %vm508_vm2, %v1476_v22, %v1454_v24  ;;  %v1485_v25 = vsel %vm508_vm2, %v1477_v35, %v1456_v39 }
 0x5dd   :  { %1878 = vmatmul.msk.f32.gmra.mxu0 %vm520_vm0, %v1484_v17 }
 0x5e1   :  { %v1458_v5 = vpop.permute.xlu1 %1457  ;;  %v1722_v62 = vpop.permute.xlu2 %1721 }
 0x5e2   :  { %v1426_v26 = vpop.permute.xlu0 %1425  ;;  %v1732_v63 = vsel %vm267_vm1, %v1887_v61, %v1722_v62 }
 0x5e3   :  { %v1478_v29 = vsel %vm499_vm15, %v2525_v1, %v1426_v26  ;;  %v1888_v1 = vld [vmem:[%s2695_s0 + $0x20] ss:$2 sm:$0xff] }
 0x5e4   :  { %v1486_v33 = vsel %vm508_vm2, %v1478_v29, %v1458_v5 }
 0x5e5   :  { %1879 = vmatmul.msk.f32.gmra.mxu0 %vm520_vm0, %v1485_v25 }
 0x5e9   :  { %v1430_v28 = vpop.permute.xlu1 %1429 }
 0x5ea   :  { %v1460_v37 = vpop.permute.xlu0 %1459  ;;  %v1480_v43 = vsel %vm499_vm15, %v2536_v6, %v1430_v28 }
 0x5eb   :  { %v1487_v42 = vsel %vm508_vm2, %v1479_v41, %v1460_v37  ;;  %v1488_v45 = vsel %vm508_vm2, %v1480_v43, %v1462_v44 }
 0x5ed   :  { %1880 = vmatmul.msk.f32.gmra.mxu0 %vm520_vm0, %v1486_v33 }
 0x5f1   :  { %v1464_v46 = vpop.permute.xlu1 %1463 }
 0x5f2   :  { %v1432_v34 = vpop.permute.xlu0 %1431 }
 0x5f3   :  { %v1481_v14 = vsel %vm499_vm15, %v1391_v21, %v1432_v34 }
 0x5f4   :  { %v1489_v27 = vsel %vm508_vm2, %v1481_v14, %v1464_v46 }
 0x5f5   :  { %1881 = vmatmul.msk.f32.gmra.mxu0 %vm520_vm0, %v1487_v42 }
 0x5f9   :  { %v1720_v54 = vpop.permute.xlu1 %1719 }
 0x5fa   :  { %v1466_v48 = vpop.permute.xlu0 %1465  ;;  %v1731_v55 = vsel %vm267_vm1, %v1700_v53, %v1720_v54 }
 0x5fb   :  { %v1490_v50 = vsel %vm508_vm2, %v1482_v49, %v1466_v48  ;;  %1894 = vmatmul.msk.f32.vlgmr.msrb.gmra.mxu1 %vm499_vm15, %v1731_v55 }
 0x5fd   :  { %1882 = vmatmul.msk.f32.gmra.mxu0 %vm520_vm0, %v1488_v45 }
 0x601   :  { %v1726_v51 = vpop.permute.xlu1 %1725 }
 0x602   :  { %v1724_v2 = vpop.permute.xlu0 %1723  ;;  %v1734_v6 = vsel %vm267_vm1, %v1889_v3, %v1726_v51 }
 0x603   :  { %1895 = vmatmul.msk.f32.gmra.mxu1 %vm499_vm15, %v1732_v63  ;;  %v1733_v52 = vsel %vm267_vm1, %v1888_v1, %v1724_v2 }
 0x605   :  { %1883 = vmatmul.msk.f32.gmra.mxu0 %vm520_vm0, %v1489_v27 }
 0x60b   :  { %1896 = vmatmul.msk.f32.gmra.mxu1 %vm499_vm15, %v1733_v52 }
 0x60d   :  { %1884 = vmatmul.msk.f32.gmra.mxu0 %vm520_vm0, %v1490_v50 }
 0x613   :  { %1897 = vmatmul.msk.f32.gmra.mxu1 %vm499_vm15, %v1734_v6 }
 0x652   :  { %v1536_v4 = vpop.f32.mrf.mxu0 }
 0x653   :  { %v1560_v0 = vsel %vm499_vm15, %v1536_v4, 0.0 }
 0x65a   :  { %v1539_v7 = vpop.f32.mrf.mxu0 }
 0x65b   :  { %v1561_v21 = vsel %vm499_vm15, %v1539_v7, 0.0 }
 0x65c   :  { %v1562_v9 = vadd.f32 %v1561_v21, %v1560_v0 }
 0x662   :  { %v1542_v56 = vpop.f32.mrf.mxu0 }
 0x663   :  { %v1563_v8 = vsel %vm499_vm15, %v1542_v56, 0.0 }
 0x664   :  { %v1564_v60 = vadd.f32 %v1563_v8, %v1562_v9 }
 0x66a   :  { %v1545_v57 = vpop.f32.mrf.mxu0 }
 0x66b   :  { %v1565_v11 = vsel %vm499_vm15, %v1545_v57, 0.0 }
 0x66c   :  { %v1566_v15 = vadd.f32 %v1565_v11, %v1564_v60 }
 0x672   :  { %v1548_v58 = vpop.f32.mrf.mxu0 }
 0x673   :  { %v1567_v13 = vsel %vm499_vm15, %v1548_v58, 0.0 }
 0x674   :  { %v1568_v18 = vadd.f32 %v1567_v13, %v1566_v15  ;;  %v1885_v13 = vld [vmem:[%s2699_s4 + $0x3] sm:$0x1] }
 0x678   :  { %v2641_v11 = vpop.f32.mrf.mxu1 }
 0x67a   :  { %v1551_v59 = vpop.f32.mrf.mxu0 }
 0x67b   :  { %v1569_v16 = vsel %vm499_vm15, %v1551_v59, 0.0 }
 0x67c   :  { %v1570_v20 = vadd.f32 %v1569_v16, %v1568_v18 }
 0x682   :  { %v1554_v12 = vpop.f32.mrf.mxu0 }
 0x683   :  { %v1571_v10 = vsel %vm499_vm15, %v1554_v12, 0.0 }
 0x684   :  { %v1572_v23 = vadd.f32 %v1571_v10, %v1570_v20  ;;  %v1910_v10 = vld [vmem:[%s2698_s5 + $0x3] ss:$0 sm:$0xff] }
 0x68a   :  { %v1557_v40 = vpop.f32.mrf.mxu0 }
 0x68b   :  { %v1573_v22 = vsel %vm499_vm15, %v1557_v40, 0.0 }
 0x68c   :  { %v1574_v24 = vadd.f32 %v1573_v22, %v1572_v23 }
 0x68e   :  { %v1575_v30 = vrot.slane %v1574_v24, 4 }
 0x690   :  { %v1576_v17 = vadd.f32 %v1575_v30, %v1574_v24  ;;  %v1772_v24 = vpop.f32.mrf.mxu1 }
 0x692   :  { %v1577_v31 = vrot.slane %v1576_v17, 2 }
 0x694   :  { %v1578_v35 = vadd.f32 %v1577_v31, %v1576_v17 }
 0x696   :  { %v1579_v39 = vrot.slane %v1578_v35, 1 }
 0x698   :  { %v1580_v25 = vadd.f32 %v1579_v39, %v1578_v35 }
 0x69a   :  { %v1581_v26 = vmul.f32 0.015625, %v1580_v25 }
 0x69c   :  { %v1582_v29 = vsub.f32 %v1536_v4, %v1581_v26  ;;  %v1583_v5 = vsub.f32 %v1539_v7, %v1581_v26  ;;  %v1584_v33 = vsub.f32 %v1542_v56, %v1581_v26  ;;  %v1585_v38 = vsub.f32 %v1545_v57, %v1581_v26 }
 0x69d   :  { %v1586_v36 = vsub.f32 %v1548_v58, %v1581_v26  ;;  %v1587_v42 = vsub.f32 %v1551_v59, %v1581_v26  ;;  %v1588_v34 = vsub.f32 %v1554_v12, %v1581_v26  ;;  %v1589_v47 = vsub.f32 %v1557_v40, %v1581_v26 }
 0x69e   :  { %v1590_v19 = vmul.f32 %v1582_v29, %v1582_v29  ;;  %v1591_v37 = vmul.f32 %v1583_v5, %v1583_v5  ;;  %v1592_v41 = vmul.f32 %v1584_v33, %v1584_v33  ;;  %v1593_v28 = vmul.f32 %v1585_v38, %v1585_v38 }
 0x69f   :  { %v1594_v14 = vmul.f32 %v1586_v36, %v1586_v36  ;;  %v1595_v48 = vmul.f32 %v1587_v42, %v1587_v42  ;;  %v1596_v53 = vmul.f32 %v1588_v34, %v1588_v34  ;;  %v1597_v61 = vmul.f32 %v1589_v47, %v1589_v47 }
 0x6a0   :  { %v1598_v43 = vsel %vm499_vm15, %v1590_v19, 0.0  ;;  %v1599_v44 = vsel %vm499_vm15, %v1591_v37, 0.0  ;;  %v1601_v46 = vsel %vm499_vm15, %v1592_v41, 0.0  ;;  %v1603_v49 = vsel %vm499_vm15, %v1593_v28, 0.0 }
 0x6a1   :  { %v1600_v45 = vadd.f32 %v1599_v44, %v1598_v43  ;;  %v1605_v54 = vsel %vm499_vm15, %v1594_v14, 0.0  ;;  %v1607_v62 = vsel %vm499_vm15, %v1595_v48, 0.0  ;;  %v1609_v1 = vsel %vm499_vm15, %v1596_v53, 0.0 }
 0x6a2   :  { %v1611_v52 = vsel %vm499_vm15, %v1597_v61, 0.0 }
 0x6a3   :  { %v1602_v27 = vadd.f32 %v1601_v46, %v1600_v45 }
 0x6a5   :  { %v1604_v50 = vadd.f32 %v1603_v49, %v1602_v27 }
 0x6a7   :  { %v1606_v55 = vadd.f32 %v1605_v54, %v1604_v50 }
 0x6a9   :  { %v1608_v63 = vadd.f32 %v1607_v62, %v1606_v55 }
 0x6ab   :  { %v1610_v2 = vadd.f32 %v1609_v1, %v1608_v63  ;;  %v1775_v63 = vpop.f32.mrf.mxu1 }
 0x6ad   :  { %v1612_v3 = vadd.f32 %v1611_v52, %v1610_v2 }
 0x6af   :  { %v1613_v51 = vrot.slane %v1612_v3, 4 }
 0x6b1   :  { %v1614_v6 = vadd.f32 %v1613_v51, %v1612_v3 }
 0x6b3   :  { %v1615_v4 = vrot.slane %v1614_v6, 2 }
 0x6b5   :  { %v1616_v7 = vadd.f32 %v1615_v4, %v1614_v6  ;;  %v1770_v6 = vadd.f32 %v1911_v32, %v2641_v11 }
 0x6b7   :  { %v1617_v56 = vrot.slane %v1616_v7, 1 }
 0x6b9   :  { %v1618_v57 = vadd.f32 %v1617_v56, %v1616_v7  ;;  %v1778_v7 = vpop.f32.mrf.mxu1 }
 0x6bb   :  { %v1619_v58 = vmul.f32 0.015625, %v1618_v57 }
 0x6bd   :  { %v1620_v59 = vadd.f32 1e-05, %v1619_v58  ;;  %v1773_v58 = vadd.f32 %v1911_v32, %v1772_v24 }
 0x6bf   :  { %1982 = vrsqrt.f32 %v1620_v59  ;;  %vm1627_vm0 = vweird.f32 %v1620_v59 }
 0x6c5   :  { %v1983_v21 = vpop.eup %1982 }
 0x6c6   :  { %v1622_v0 = vmul.f32 %v1983_v21, %v1620_v59  ;;  %vm1628_vm1 = vweird.f32 %v1983_v21 }
 0x6c7   :  { %vm1629_vm2 = vmor %vm1627_vm0, %vm1628_vm1 }
 0x6c8   :  { %v1623_v8 = vmul.f32 %v1983_v21, %v1622_v0 }
 0x6ca   :  { %v1624_v9 = vmul.f32 0.5, %v1623_v8  ;;  %v1776_v8 = vadd.f32 %v1911_v32, %v1775_v63 }
 0x6cc   :  { %v1625_v60 = vsub.f32 1.5, %v1624_v9  ;;  %v1779_v9 = vadd.f32 %v1911_v32, %v1778_v7 }
 0x6ce   :  { %v1626_v12 = vmul.f32 %v1983_v21, %v1625_v60 }
 0x6d0   :  { %v1630_v15 = vsel %vm1629_vm2, %v1983_v21, %v1626_v12 }
 0x6d1   :  { %v1633_v16 = vmul.f32 %v1885_v13, %v1630_v15 }
 0x6d3   :  { %v1634_v18 = vperm.slane %v1633_v16, 0 }
 0x6d5   :  { %v1635_v20 = vmul.f32 %v1634_v18, %v1582_v29  ;;  %v1636_v23 = vmul.f32 %v1634_v18, %v1583_v5  ;;  %v1637_v40 = vmul.f32 %v1634_v18, %v1584_v33  ;;  %v1638_v22 = vmul.f32 %v1634_v18, %v1585_v38 }
 0x6d6   :  { %v1639_v30 = vmul.f32 %v1634_v18, %v1586_v36  ;;  %v1640_v17 = vmul.f32 %v1634_v18, %v1587_v42  ;;  %v1641_v31 = vmul.f32 %v1634_v18, %v1588_v34  ;;  %v1642_v35 = vmul.f32 %v1634_v18, %v1589_v47 }
 0x6d7   :  { %v1648_v39 = vadd.f32 %v1910_v10, %v1635_v20  ;;  %v1649_v25 = vadd.f32 %v1910_v10, %v1636_v23  ;;  %v1650_v26 = vadd.f32 %v1910_v10, %v1637_v40  ;;  %v1651_v19 = vadd.f32 %v1910_v10, %v1638_v22 }
 0x6d8   :  { %v1652_v37 = vadd.f32 %v1910_v10, %v1639_v30  ;;  %v1653_v41 = vadd.f32 %v1910_v10, %v1640_v17  ;;  %v1654_v28 = vadd.f32 %v1910_v10, %v1641_v31  ;;  %v1655_v43 = vadd.f32 %v1910_v10, %v1642_v35 }
 0x6d9   :  { %v1656_v44 = vrot.slane %v1648_v39, 1  ;;  %v1657_v45 = vrot.slane %v1649_v25, 1  ;;  %v1658_v14 = vrot.slane %v1650_v26, 1  ;;  %v1659_v29 = vrot.slane %v1651_v19, 1 }
 0x6da   :  { %v1660_v5 = vrot.slane %v1652_v37, 1  ;;  %v1661_v33 = vrot.slane %v1653_v41, 1  ;;  %v1662_v38 = vrot.slane %v1654_v28, 1  ;;  %v1663_v46 = vrot.slane %v1655_v43, 1 }
 0x6db   :  { %v1669_v36 = vsel %vm1664_vm6, %v1658_v14, %v1659_v29  ;;  %v1670_v42 = vsel %vm1664_vm6, %v1657_v45, %v1658_v14  ;;  %v1671_v34 = vsel %vm1664_vm6, %v1656_v44, %v1657_v45 }
 0x6dc   :  { %v1667_v27 = vsel %vm1664_vm6, %v1660_v5, %v1661_v33  ;;  %v1668_v47 = vsel %vm1664_vm6, %v1659_v29, %v1660_v5  ;;  %v1666_v48 = vsel %vm1664_vm6, %v1661_v33, %v1662_v38  ;;  %v1673_v49 = vadd.f32 %v1671_v34, %v1648_v39 }
 0x6dd   :  { %v1674_v50 = vadd.f32 %v1670_v42, %v1649_v25  ;;  %v1675_v53 = vadd.f32 %v1669_v36, %v1650_v26  ;;  %v1665_v54 = vsel %vm1664_vm6, %v1662_v38, %v1663_v46  ;;  %v1676_v55 = vadd.f32 %v1668_v47, %v1651_v19 }
 0x6de   :  { %v1672_v61 = vsel %vm1664_vm6, %v1663_v46, %v1656_v44  ;;  %v1677_v62 = vadd.f32 %v1667_v27, %v1652_v37  ;;  %1681 = vst.msk [vmem:[#allocation2] sm:$0xff] %vm499_vm15, %v1673_v49  ;;  %v1678_v1 = vadd.f32 %v1666_v48, %v1653_v41  ;;  %v1679_v2 = vadd.f32 %v1665_v54, %v1654_v28 }
 0x6df   :  { %1682 = vst.msk [vmem:[#allocation2 + $0x8] sm:$0xff] %vm499_vm15, %v1674_v50  ;;  %v1680_v52 = vadd.f32 %v1672_v61, %v1655_v43 }
 0x6e0   :  { %1683 = vst.msk [vmem:[#allocation2 + $0x10] sm:$0xff] %vm499_vm15, %v1675_v53 }
 0x6e1   :  { %1684 = vst.msk [vmem:[#allocation2 + $0x18] sm:$0xff] %vm499_vm15, %v1676_v55 }
 0x6e2   :  { %1685 = vst.msk [vmem:[#allocation2 + $0x20] sm:$0xff] %vm499_vm15, %v1677_v62 }
 0x6e3   :  { %1686 = vst.msk [vmem:[#allocation2 + $0x28] sm:$0xff] %vm499_vm15, %v1678_v1 }
 0x6e4   :  { %1687 = vst.msk [vmem:[#allocation2 + $0x30] sm:$0xff] %vm499_vm15, %v1679_v2 }
 0x6e5   :  { %1688 = vst.msk [vmem:[#allocation2 + $0x38] sm:$0xff] %vm499_vm15, %v1680_v52 }
 0x6e6   :  { %v1689_v3 = vld [vmem:[#allocation2] ss:$2 sm:$0xff] }
 0x6e7   :  { %v1696_v51 = vmul.f32 0.5, %v1689_v3 }
 0x6e8   :  { %v1691_v4 = vld [vmem:[#allocation2 + $0x10] ss:$2 sm:$0xff] }
 0x6e9   :  { %v1781_v56 = vadd.f32 %v1770_v6, %v1696_v51  ;;  %v1697_v57 = vmul.f32 0.5, %v1691_v4 }
 0x6ea   :  { %v1693_v59 = vld [vmem:[#allocation2 + $0x20] ss:$2 sm:$0xff] }
 0x6eb   :  { %1785 = vst.msk [vmem:[%s2702_s8] sm:$0xff] %vm499_vm15, %v1781_v56  ;;  %v1782_v21 = vadd.f32 %v1773_v58, %v1697_v57  ;;  %v1698_v0 = vmul.f32 0.5, %v1693_v59 }
 0x6ec   :  { %v1695_v60 = vld [vmem:[#allocation2 + $0x30] ss:$2 sm:$0xff] }
 0x6ed   :  { %1786 = vst.msk [vmem:[%s2702_s8 + $0x8] sm:$0xff] %vm499_vm15, %v1782_v21  ;;  %v1783_v11 = vadd.f32 %v1776_v8, %v1698_v0  ;;  %v1699_v12 = vmul.f32 0.5, %v1695_v60 }
 0x6ef   :  { %1787 = vst.msk [vmem:[%s2702_s8 + $0x10] sm:$0xff] %vm499_vm15, %v1783_v11  ;;  %v1784_v13 = vadd.f32 %v1779_v9, %v1699_v12 }
 0x6f1   :  { %1788 = vst.msk [vmem:[%s2702_s8 + $0x18] sm:$0xff] %vm499_vm15, %v1784_v13 }

</bundles_post_ra>
